<compile_context>
chip_gen: v7x
topology: tpu7x:2x2x1
jax: 0.10.0
libtpu: 0.0.40
codegen_flags: <defaults>
</compile_context>

<pallas_src>
import functools

import jax
import jax.numpy as jnp
import numpy as np
from jax.experimental import pallas as pl
from jax.experimental.pallas import tpu as pltpu


# Offsets into the packed f32 weight vector (row-major flattened).
_W1_OFF = 0            # (3, 8)  -> 24
_B1_OFF = 24           # (8,)    ->  8
_W2_OFF = 32           # (8, 4)  -> 32
_B2_OFF = 64           # (4,)    ->  4
_W3_OFF = 68           # (4, out_dim)


def _bias_force_kernel(w_ref, pos_ref, tgt_ref, out_ref, *, mode, compute_dtype):
    """pos/tgt/out blocks: (BR, L) f32, lane-interleaved [x0,y0,x1,y1,...].
    w_ref: packed MLP weights, f32, SMEM resident (scalar reads)."""
    p = pos_ref[...]                       # (BR, L)
    t = tgt_ref[...]
    L = p.shape[-1]

    lane = jax.lax.broadcasted_iota(jnp.int32, p.shape, 1)
    is_even = (lane & 1) == 0              # x-coordinate lanes

    # Distance (kept in f32): d2 + d2 of the partner lane of each (x, y) pair.
    # pltpu.roll == jnp.roll semantics; shifts kept non-negative.
    d = t - p                              # even lanes: tx-px, odd lanes: ty-py
    d2 = d * d
    d2_nxt = pltpu.roll(d2, L - 1, axis=1)     # [i] <- d2[i+1]
    d2_prv = pltpu.roll(d2, 1, axis=1)         # [i] <- d2[i-1]
    dist = jnp.sqrt(d2 + jnp.where(is_even, d2_nxt, d2_prv))

    # x / y coordinate at every lane (each pair carries both values).
    p_nxt = pltpu.roll(p, L - 1, axis=1)
    p_prv = pltpu.roll(p, 1, axis=1)
    p_partner = jnp.where(is_even, p_nxt, p_prv)   # even: py, odd: px
    px = jnp.where(is_even, p, p_partner)          # px everywhere
    py = jnp.where(is_even, p_partner, p)          # py everywhere

    cdt = compute_dtype
    px = px.astype(cdt)
    py = py.astype(cdt)
    dist_c = dist.astype(cdt)

    w = lambda i: w_ref[i].astype(cdt)             # scalar read from SMEM

    # Fused layers 1+2: consume each hidden unit immediately into 4 running
    # accumulators (seeded with b2) instead of materializing 8 h1 + 4 h2 temps.
    acc = [w(_B2_OFF + k) for k in range(4)]
    for j in range(8):
        h = (w(_W1_OFF + 0 * 8 + j) * px
             + w(_W1_OFF + 1 * 8 + j) * py
             + w(_W1_OFF + 2 * 8 + j) * dist_c
             + w(_B1_OFF + j))
        h = jnp.maximum(h, 0.0)
        for k in range(4):
            acc[k] = acc[k] + h * w(_W2_OFF + j * 4 + k)
    h2 = [jnp.maximum(a, 0.0) for a in acc]

    if mode == "force":
        # Layer 3 (4 -> 2, no bias) with per-lane blended weights: column 0 on
        # x lanes, column 1 on y lanes, so the output is produced directly in
        # the interleaved layout (no re-interleave before the store).
        o = None
        for i in range(4):
            wi = jnp.where(is_even, w(_W3_OFF + 2 * i + 0), w(_W3_OFF + 2 * i + 1))
            o = h2[i] * wi if o is None else o + h2[i] * wi
        out_ref[...] = o.astype(out_ref.dtype)
    elif mode == "scale":
        o = None
        for i in range(4):
            o = h2[i] * w(_W3_OFF + i) if o is None else o + h2[i] * w(_W3_OFF + i)
        scale = jax.nn.softplus(o.astype(jnp.float32))   # same value on both lanes
        out_ref[...] = (scale * d).astype(out_ref.dtype)  # d = target - pos (reused)
    else:
        raise NotImplementedError(mode)


def init_params(key):
    """Deterministic parameter init (torch Linear weights stored transposed,
    i.e. (in, out), as used by both the kernel packing and the reference)."""
    ks = jax.random.split(key, 6)
    return {
        "w1": jax.random.normal(ks[0], (3, 8), jnp.float32) * 0.5,
        "b1": jax.random.normal(ks[1], (8,), jnp.float32) * 0.1,
        "w2": jax.random.normal(ks[2], (8, 4), jnp.float32) * 0.5,
        "b2": jax.random.normal(ks[3], (4,), jnp.float32) * 0.1,
        "w3_force": jax.random.normal(ks[4], (4, 2), jnp.float32) * 0.5,
        "w3_scale": jax.random.normal(ks[5], (4, 1), jnp.float32) * 0.5,
        "log_z": jnp.float32(0.0),  # unused in forward (matches torch module)
    }


def _pack_weights(params, bias_mode):
    w3 = params["w3_force"] if bias_mode == "force" else params["w3_scale"]
    packed = jnp.concatenate([
        params["w1"].reshape(-1),
        params["b1"].reshape(-1),
        params["w2"].reshape(-1),
        params["b2"].reshape(-1),
        w3.reshape(-1),
    ]).astype(jnp.float32)
    assert packed.shape[0] == _W3_OFF + 4 * w3.shape[1]
    return packed


def bias_force(pos, target, params, *, bias_mode="force", block_rows=256,
               lanes=512, compute_dtype=jnp.float32):
    """pos, target: float32 arrays of shape (..., 2).  Returns force with the
    same shape as pos.  compute_dtype=jnp.bfloat16 enables the faster MLP math
    path on chips with bf16 VALUs (v6e / v7x); distances stay f32."""
    assert pos.shape == target.shape and pos.shape[-1] == 2
    if bias_mode not in ("force", "scale"):
        # TODO(synk): 'pot' mode (gradient of the potential w.r.t. pos) needs
        # an analytic in-kernel backward pass through the MLP.
        raise NotImplementedError(bias_mode)

    L = int(lanes)
    assert L % 128 == 0
    assert block_rows % 8 == 0 and block_rows >= 8

    orig_shape = pos.shape
    n = int(np.prod(orig_shape))            # 2 * number of points

    # Natural interleaved layout, flattened.  No transpose anywhere.
    pos_flat = pos.reshape(-1).astype(jnp.float32)
    tgt_flat = target.reshape(-1).astype(jnp.float32)

    R = pl.cdiv(n, L)
    pad = R * L - n
    if pad:
        # Ragged tail: one contiguous zero-pad copy per input and a slice copy
        # on the output (full HBM bandwidth, unlike a transpose).  Zero pad
        # keeps sqrt/softplus finite; the padded results are sliced away.
        # When n is a multiple of `lanes` this path is skipped entirely.
        pos_flat = jnp.pad(pos_flat, (0, pad))
        tgt_flat = jnp.pad(tgt_flat, (0, pad))
    pos2 = pos_flat.reshape(R, L)            # free reshape (row-major)
    tgt2 = tgt_flat.reshape(R, L)

    if R <= 8:
        br = R                               # single (possibly tiny) block
    else:
        # Cap block rows at ~R/4 (rounded up to the 8-row sublane tile) so the
        # grid has >= ~4 steps and dimension_semantics=("parallel",) can shard
        # steps across both v7x TensorCores; v5e/v6e just see a deeper grid.
        split_cap = ((pl.cdiv(R, 4) + 7) // 8) * 8
        br = min(block_rows, split_cap)
    grid = (pl.cdiv(R, br),)

    # NOTE: when R % br != 0 the last grid block is padded by Pallas with
    # unspecified rows; sqrt/softplus on those rows may yield NaN/Inf, but they
    # are never written back to HBM (outside the output array extent).

    w_packed = _pack_weights(params, bias_mode)

    blk = pl.BlockSpec((br, L), lambda i: (i, 0))
    smem_spec = pl.BlockSpec(memory_space=pltpu.MemorySpace.SMEM)

    out2 = pl.pallas_call(
        functools.partial(_bias_force_kernel, mode=bias_mode,
                          compute_dtype=compute_dtype),
        out_shape=jax.ShapeDtypeStruct((R, L), jnp.float32),
        grid_spec=pltpu.PrefetchScalarGridSpec(
            num_scalar_prefetch=0,
            grid=grid,
            in_specs=[
                smem_spec,   # packed MLP weights (SMEM resident, scalar reads)
                blk,         # pos    (R, L) interleaved
                blk,         # target (R, L) interleaved
            ],
            out_specs=blk,
        ),
        compiler_params=pltpu.CompilerParams(
            dimension_semantics=("parallel",),
            vmem_limit_bytes=32 * 1024 * 1024,
        ),
    )(w_packed, pos2, tgt2)

    out_flat = out2.reshape(-1)              # free reshape
    if pad:
        out_flat = out_flat[:n]
    return out_flat.reshape(orig_shape)


def bias_force_ref(pos, target, params, *, bias_mode="force"):
    """Pure-JAX reference mirroring the torch forward."""
    dist = jnp.linalg.norm(pos - target, axis=-1, keepdims=True)
    x = jnp.concatenate([pos, dist], axis=-1).reshape(-1, 3)
    h1 = jnp.maximum(x @ params["w1"] + params["b1"], 0.0)
    h2 = jnp.maximum(h1 @ params["w2"] + params["b2"], 0.0)
    if bias_mode == "force":
        return (h2 @ params["w3_force"]).reshape(pos.shape)
    elif bias_mode == "scale":
        out = h2 @ params["w3_scale"]
        scale = jax.nn.softplus(out).reshape(*pos.shape[:-1], 1)
        return scale * (target - pos)
    raise NotImplementedError(bias_mode)


if __name__ == "__main__":
    key = jax.random.PRNGKey(0)
    kp, k1, k2, k3, k4 = jax.random.split(key, 5)
    params = init_params(kp)

    # Small shapes implied by the forward: (..., 2) positions.
    B, N = 2, 64
    pos = jax.random.normal(k1, (B, N, 2), jnp.float32)
    target = jax.random.normal(k2, (B, N, 2), jnp.float32)

    # 'force' mode (f32 compute path)
    force = jax.block_until_ready(bias_force(pos, target, params,
                                             bias_mode="force"))
    ref = bias_force_ref(pos, target, params, bias_mode="force")
    np.testing.assert_allclose(np.asarray(force), np.asarray(ref),
                               rtol=1e-4, atol=1e-4)
    assert force.shape == pos.shape

    # 'scale' mode
    force_s = jax.block_until_ready(bias_force(pos, target, params,
                                               bias_mode="scale"))
    ref_s = bias_force_ref(pos, target, params, bias_mode="scale")
    np.testing.assert_allclose(np.asarray(force_s), np.asarray(ref_s),
                               rtol=1e-4, atol=1e-4)
    assert force_s.shape == pos.shape

    # Multi-block + ragged-tail path (small tiles so the grid has >1 step and
    # the last block is partial).
    pos_r = jax.random.normal(k3, (1200, 2), jnp.float32)
    tgt_r = jax.random.normal(k4, (1200, 2), jnp.float32)
    out_r = jax.block_until_ready(
        bias_force(pos_r, tgt_r, params, bias_mode="force",
                   block_rows=8, lanes=128))
    ref_r = bias_force_ref(pos_r, tgt_r, params, bias_mode="force")
    np.testing.assert_allclose(np.asarray(out_r), np.asarray(ref_r),
                               rtol=1e-4, atol=1e-4)

    # Optional bf16 compute path: only on chips with bf16 VALUs (v6e / v7x),
    # checked against the f32 reference with loosened tolerances.
    kind = jax.devices()[0].device_kind.lower()
    if ("v6" in kind) or ("v7" in kind):
        out_bf = jax.block_until_ready(
            bias_force(pos, target, params, bias_mode="force",
                       compute_dtype=jnp.bfloat16))
        np.testing.assert_allclose(np.asarray(out_bf), np.asarray(ref),
                                   rtol=1e-1, atol=1e-1)

    print("KERNEL_OK")
</pallas_src>

<mosaic_0001>
module attributes {stable_mosaic.version = 11 : i64} {
  func.func @_bias_force_kernel(%arg0: i32, %arg1: memref<76xf32, #tpu.memory_space<smem>>, %arg2: memref<1x512xf32, #tpu.memory_space<vmem>>, %arg3: memref<1x512xf32, #tpu.memory_space<vmem>>, %arg4: memref<1x512xf32, #tpu.memory_space<vmem>>) attributes {dimension_semantics = [#tpu.dimension_semantics<parallel>], iteration_bounds = array<i64: 1>, scalar_prefetch = 0 : i64, scratch_operands = 0 : i64, tpu.core_type = #tpu.core_type<tc>, window_params = [{transform_indices = @transform_0, window_bounds = array<i64: 76>}, {transform_indices = @transform_1, window_bounds = array<i64: 1, 512>}, {transform_indices = @transform_2, window_bounds = array<i64: 1, 512>}, {transform_indices = @transform_3, window_bounds = array<i64: 1, 512>}]} {
    %c0 = arith.constant 0 : index
    %c0_0 = arith.constant 0 : index
    %0 = vector.load %arg2[%c0, %c0_0] : memref<1x512xf32, #tpu.memory_space<vmem>>, vector<1x512xf32>
    %c0_1 = arith.constant 0 : index
    %c0_2 = arith.constant 0 : index
    %1 = vector.load %arg3[%c0_1, %c0_2] : memref<1x512xf32, #tpu.memory_space<vmem>>, vector<1x512xf32>
    %2 = tpu.iota {dimensions = array<i32: 1>} : vector<1x512xi32>
    %c1_i32 = arith.constant 1 : i32
    %3 = vector.broadcast %c1_i32 : i32 to vector<1x512xi32>
    %4 = arith.andi %2, %3 : vector<1x512xi32>
    %c0_i32 = arith.constant 0 : i32
    %5 = vector.broadcast %c0_i32 : i32 to vector<1x512xi32>
    %6 = arith.cmpi eq, %4, %5 : vector<1x512xi32>
    %7 = arith.subf %1, %0 : vector<1x512xf32>
    %8 = arith.mulf %7, %7 : vector<1x512xf32>
    %c511_i32 = arith.constant 511 : i32
    %9 = tpu.dynamic_rotate %8 by %c511_i32 dim 1 : vector<1x512xf32>, i32 -> vector<1x512xf32>
    %c1_i32_3 = arith.constant 1 : i32
    %10 = tpu.dynamic_rotate %8 by %c1_i32_3 dim 1 : vector<1x512xf32>, i32 -> vector<1x512xf32>
    %11 = arith.select %6, %9, %10 : vector<1x512xi1>, vector<1x512xf32>
    %12 = arith.addf %8, %11 : vector<1x512xf32>
    %13 = math.sqrt %12 : vector<1x512xf32>
    %c511_i32_4 = arith.constant 511 : i32
    %14 = tpu.dynamic_rotate %0 by %c511_i32_4 dim 1 : vector<1x512xf32>, i32 -> vector<1x512xf32>
    %c1_i32_5 = arith.constant 1 : i32
    %15 = tpu.dynamic_rotate %0 by %c1_i32_5 dim 1 : vector<1x512xf32>, i32 -> vector<1x512xf32>
    %16 = arith.select %6, %14, %15 : vector<1x512xi1>, vector<1x512xf32>
    %17 = arith.select %6, %0, %16 : vector<1x512xi1>, vector<1x512xf32>
    %18 = arith.select %6, %16, %0 : vector<1x512xi1>, vector<1x512xf32>
    %c64 = arith.constant 64 : index
    %19 = memref.load %arg1[%c64] : memref<76xf32, #tpu.memory_space<smem>>
    %c65 = arith.constant 65 : index
    %20 = memref.load %arg1[%c65] : memref<76xf32, #tpu.memory_space<smem>>
    %c66 = arith.constant 66 : index
    %21 = memref.load %arg1[%c66] : memref<76xf32, #tpu.memory_space<smem>>
    %c67 = arith.constant 67 : index
    %22 = memref.load %arg1[%c67] : memref<76xf32, #tpu.memory_space<smem>>
    %c0_6 = arith.constant 0 : index
    %23 = memref.load %arg1[%c0_6] : memref<76xf32, #tpu.memory_space<smem>>
    %24 = vector.broadcast %23 : f32 to vector<1x512xf32>
    %25 = arith.mulf %24, %17 : vector<1x512xf32>
    %c8 = arith.constant 8 : index
    %26 = memref.load %arg1[%c8] : memref<76xf32, #tpu.memory_space<smem>>
    %27 = vector.broadcast %26 : f32 to vector<1x512xf32>
    %28 = arith.mulf %27, %18 : vector<1x512xf32>
    %29 = arith.addf %25, %28 : vector<1x512xf32>
    %c16 = arith.constant 16 : index
    %30 = memref.load %arg1[%c16] : memref<76xf32, #tpu.memory_space<smem>>
    %31 = vector.broadcast %30 : f32 to vector<1x512xf32>
    %32 = arith.mulf %31, %13 : vector<1x512xf32>
    %33 = arith.addf %29, %32 : vector<1x512xf32>
    %c24 = arith.constant 24 : index
    %34 = memref.load %arg1[%c24] : memref<76xf32, #tpu.memory_space<smem>>
    %35 = vector.broadcast %34 : f32 to vector<1x512xf32>
    %36 = arith.addf %33, %35 : vector<1x512xf32>
    %cst = arith.constant 0.000000e+00 : f32
    %37 = vector.broadcast %cst : f32 to vector<1x512xf32>
    %38 = arith.maximumf %36, %37 : vector<1x512xf32>
    %c32 = arith.constant 32 : index
    %39 = memref.load %arg1[%c32] : memref<76xf32, #tpu.memory_space<smem>>
    %40 = vector.broadcast %39 : f32 to vector<1x512xf32>
    %41 = arith.mulf %38, %40 : vector<1x512xf32>
    %42 = vector.broadcast %19 : f32 to vector<1x512xf32>
    %43 = arith.addf %42, %41 : vector<1x512xf32>
    %c33 = arith.constant 33 : index
    %44 = memref.load %arg1[%c33] : memref<76xf32, #tpu.memory_space<smem>>
    %45 = vector.broadcast %44 : f32 to vector<1x512xf32>
    %46 = arith.mulf %38, %45 : vector<1x512xf32>
    %47 = vector.broadcast %20 : f32 to vector<1x512xf32>
    %48 = arith.addf %47, %46 : vector<1x512xf32>
    %c34 = arith.constant 34 : index
    %49 = memref.load %arg1[%c34] : memref<76xf32, #tpu.memory_space<smem>>
    %50 = vector.broadcast %49 : f32 to vector<1x512xf32>
    %51 = arith.mulf %38, %50 : vector<1x512xf32>
    %52 = vector.broadcast %21 : f32 to vector<1x512xf32>
    %53 = arith.addf %52, %51 : vector<1x512xf32>
    %c35 = arith.constant 35 : index
    %54 = memref.load %arg1[%c35] : memref<76xf32, #tpu.memory_space<smem>>
    %55 = vector.broadcast %54 : f32 to vector<1x512xf32>
    %56 = arith.mulf %38, %55 : vector<1x512xf32>
    %57 = vector.broadcast %22 : f32 to vector<1x512xf32>
    %58 = arith.addf %57, %56 : vector<1x512xf32>
    %c1 = arith.constant 1 : index
    %59 = memref.load %arg1[%c1] : memref<76xf32, #tpu.memory_space<smem>>
    %60 = vector.broadcast %59 : f32 to vector<1x512xf32>
    %61 = arith.mulf %60, %17 : vector<1x512xf32>
    %c9 = arith.constant 9 : index
    %62 = memref.load %arg1[%c9] : memref<76xf32, #tpu.memory_space<smem>>
    %63 = vector.broadcast %62 : f32 to vector<1x512xf32>
    %64 = arith.mulf %63, %18 : vector<1x512xf32>
    %65 = arith.addf %61, %64 : vector<1x512xf32>
    %c17 = arith.constant 17 : index
    %66 = memref.load %arg1[%c17] : memref<76xf32, #tpu.memory_space<smem>>
    %67 = vector.broadcast %66 : f32 to vector<1x512xf32>
    %68 = arith.mulf %67, %13 : vector<1x512xf32>
    %69 = arith.addf %65, %68 : vector<1x512xf32>
    %c25 = arith.constant 25 : index
    %70 = memref.load %arg1[%c25] : memref<76xf32, #tpu.memory_space<smem>>
    %71 = vector.broadcast %70 : f32 to vector<1x512xf32>
    %72 = arith.addf %69, %71 : vector<1x512xf32>
    %cst_7 = arith.constant 0.000000e+00 : f32
    %73 = vector.broadcast %cst_7 : f32 to vector<1x512xf32>
    %74 = arith.maximumf %72, %73 : vector<1x512xf32>
    %c36 = arith.constant 36 : index
    %75 = memref.load %arg1[%c36] : memref<76xf32, #tpu.memory_space<smem>>
    %76 = vector.broadcast %75 : f32 to vector<1x512xf32>
    %77 = arith.mulf %74, %76 : vector<1x512xf32>
    %78 = arith.addf %43, %77 : vector<1x512xf32>
    %c37 = arith.constant 37 : index
    %79 = memref.load %arg1[%c37] : memref<76xf32, #tpu.memory_space<smem>>
    %80 = vector.broadcast %79 : f32 to vector<1x512xf32>
    %81 = arith.mulf %74, %80 : vector<1x512xf32>
    %82 = arith.addf %48, %81 : vector<1x512xf32>
    %c38 = arith.constant 38 : index
    %83 = memref.load %arg1[%c38] : memref<76xf32, #tpu.memory_space<smem>>
    %84 = vector.broadcast %83 : f32 to vector<1x512xf32>
    %85 = arith.mulf %74, %84 : vector<1x512xf32>
    %86 = arith.addf %53, %85 : vector<1x512xf32>
    %c39 = arith.constant 39 : index
    %87 = memref.load %arg1[%c39] : memref<76xf32, #tpu.memory_space<smem>>
    %88 = vector.broadcast %87 : f32 to vector<1x512xf32>
    %89 = arith.mulf %74, %88 : vector<1x512xf32>
    %90 = arith.addf %58, %89 : vector<1x512xf32>
    %c2 = arith.constant 2 : index
    %91 = memref.load %arg1[%c2] : memref<76xf32, #tpu.memory_space<smem>>
    %92 = vector.broadcast %91 : f32 to vector<1x512xf32>
    %93 = arith.mulf %92, %17 : vector<1x512xf32>
    %c10 = arith.constant 10 : index
    %94 = memref.load %arg1[%c10] : memref<76xf32, #tpu.memory_space<smem>>
    %95 = vector.broadcast %94 : f32 to vector<1x512xf32>
    %96 = arith.mulf %95, %18 : vector<1x512xf32>
    %97 = arith.addf %93, %96 : vector<1x512xf32>
    %c18 = arith.constant 18 : index
    %98 = memref.load %arg1[%c18] : memref<76xf32, #tpu.memory_space<smem>>
    %99 = vector.broadcast %98 : f32 to vector<1x512xf32>
    %100 = arith.mulf %99, %13 : vector<1x512xf32>
    %101 = arith.addf %97, %100 : vector<1x512xf32>
    %c26 = arith.constant 26 : index
    %102 = memref.load %arg1[%c26] : memref<76xf32, #tpu.memory_space<smem>>
    %103 = vector.broadcast %102 : f32 to vector<1x512xf32>
    %104 = arith.addf %101, %103 : vector<1x512xf32>
    %cst_8 = arith.constant 0.000000e+00 : f32
    %105 = vector.broadcast %cst_8 : f32 to vector<1x512xf32>
    %106 = arith.maximumf %104, %105 : vector<1x512xf32>
    %c40 = arith.constant 40 : index
    %107 = memref.load %arg1[%c40] : memref<76xf32, #tpu.memory_space<smem>>
    %108 = vector.broadcast %107 : f32 to vector<1x512xf32>
    %109 = arith.mulf %106, %108 : vector<1x512xf32>
    %110 = arith.addf %78, %109 : vector<1x512xf32>
    %c41 = arith.constant 41 : index
    %111 = memref.load %arg1[%c41] : memref<76xf32, #tpu.memory_space<smem>>
    %112 = vector.broadcast %111 : f32 to vector<1x512xf32>
    %113 = arith.mulf %106, %112 : vector<1x512xf32>
    %114 = arith.addf %82, %113 : vector<1x512xf32>
    %c42 = arith.constant 42 : index
    %115 = memref.load %arg1[%c42] : memref<76xf32, #tpu.memory_space<smem>>
    %116 = vector.broadcast %115 : f32 to vector<1x512xf32>
    %117 = arith.mulf %106, %116 : vector<1x512xf32>
    %118 = arith.addf %86, %117 : vector<1x512xf32>
    %c43 = arith.constant 43 : index
    %119 = memref.load %arg1[%c43] : memref<76xf32, #tpu.memory_space<smem>>
    %120 = vector.broadcast %119 : f32 to vector<1x512xf32>
    %121 = arith.mulf %106, %120 : vector<1x512xf32>
    %122 = arith.addf %90, %121 : vector<1x512xf32>
    %c3 = arith.constant 3 : index
    %123 = memref.load %arg1[%c3] : memref<76xf32, #tpu.memory_space<smem>>
    %124 = vector.broadcast %123 : f32 to vector<1x512xf32>
    %125 = arith.mulf %124, %17 : vector<1x512xf32>
    %c11 = arith.constant 11 : index
    %126 = memref.load %arg1[%c11] : memref<76xf32, #tpu.memory_space<smem>>
    %127 = vector.broadcast %126 : f32 to vector<1x512xf32>
    %128 = arith.mulf %127, %18 : vector<1x512xf32>
    %129 = arith.addf %125, %128 : vector<1x512xf32>
    %c19 = arith.constant 19 : index
    %130 = memref.load %arg1[%c19] : memref<76xf32, #tpu.memory_space<smem>>
    %131 = vector.broadcast %130 : f32 to vector<1x512xf32>
    %132 = arith.mulf %131, %13 : vector<1x512xf32>
    %133 = arith.addf %129, %132 : vector<1x512xf32>
    %c27 = arith.constant 27 : index
    %134 = memref.load %arg1[%c27] : memref<76xf32, #tpu.memory_space<smem>>
    %135 = vector.broadcast %134 : f32 to vector<1x512xf32>
    %136 = arith.addf %133, %135 : vector<1x512xf32>
    %cst_9 = arith.constant 0.000000e+00 : f32
    %137 = vector.broadcast %cst_9 : f32 to vector<1x512xf32>
    %138 = arith.maximumf %136, %137 : vector<1x512xf32>
    %c44 = arith.constant 44 : index
    %139 = memref.load %arg1[%c44] : memref<76xf32, #tpu.memory_space<smem>>
    %140 = vector.broadcast %139 : f32 to vector<1x512xf32>
    %141 = arith.mulf %138, %140 : vector<1x512xf32>
    %142 = arith.addf %110, %141 : vector<1x512xf32>
    %c45 = arith.constant 45 : index
    %143 = memref.load %arg1[%c45] : memref<76xf32, #tpu.memory_space<smem>>
    %144 = vector.broadcast %143 : f32 to vector<1x512xf32>
    %145 = arith.mulf %138, %144 : vector<1x512xf32>
    %146 = arith.addf %114, %145 : vector<1x512xf32>
    %c46 = arith.constant 46 : index
    %147 = memref.load %arg1[%c46] : memref<76xf32, #tpu.memory_space<smem>>
    %148 = vector.broadcast %147 : f32 to vector<1x512xf32>
    %149 = arith.mulf %138, %148 : vector<1x512xf32>
    %150 = arith.addf %118, %149 : vector<1x512xf32>
    %c47 = arith.constant 47 : index
    %151 = memref.load %arg1[%c47] : memref<76xf32, #tpu.memory_space<smem>>
    %152 = vector.broadcast %151 : f32 to vector<1x512xf32>
    %153 = arith.mulf %138, %152 : vector<1x512xf32>
    %154 = arith.addf %122, %153 : vector<1x512xf32>
    %c4 = arith.constant 4 : index
    %155 = memref.load %arg1[%c4] : memref<76xf32, #tpu.memory_space<smem>>
    %156 = vector.broadcast %155 : f32 to vector<1x512xf32>
    %157 = arith.mulf %156, %17 : vector<1x512xf32>
    %c12 = arith.constant 12 : index
    %158 = memref.load %arg1[%c12] : memref<76xf32, #tpu.memory_space<smem>>
    %159 = vector.broadcast %158 : f32 to vector<1x512xf32>
    %160 = arith.mulf %159, %18 : vector<1x512xf32>
    %161 = arith.addf %157, %160 : vector<1x512xf32>
    %c20 = arith.constant 20 : index
    %162 = memref.load %arg1[%c20] : memref<76xf32, #tpu.memory_space<smem>>
    %163 = vector.broadcast %162 : f32 to vector<1x512xf32>
    %164 = arith.mulf %163, %13 : vector<1x512xf32>
    %165 = arith.addf %161, %164 : vector<1x512xf32>
    %c28 = arith.constant 28 : index
    %166 = memref.load %arg1[%c28] : memref<76xf32, #tpu.memory_space<smem>>
    %167 = vector.broadcast %166 : f32 to vector<1x512xf32>
    %168 = arith.addf %165, %167 : vector<1x512xf32>
    %cst_10 = arith.constant 0.000000e+00 : f32
    %169 = vector.broadcast %cst_10 : f32 to vector<1x512xf32>
    %170 = arith.maximumf %168, %169 : vector<1x512xf32>
    %c48 = arith.constant 48 : index
    %171 = memref.load %arg1[%c48] : memref<76xf32, #tpu.memory_space<smem>>
    %172 = vector.broadcast %171 : f32 to vector<1x512xf32>
    %173 = arith.mulf %170, %172 : vector<1x512xf32>
    %174 = arith.addf %142, %173 : vector<1x512xf32>
    %c49 = arith.constant 49 : index
    %175 = memref.load %arg1[%c49] : memref<76xf32, #tpu.memory_space<smem>>
    %176 = vector.broadcast %175 : f32 to vector<1x512xf32>
    %177 = arith.mulf %170, %176 : vector<1x512xf32>
    %178 = arith.addf %146, %177 : vector<1x512xf32>
    %c50 = arith.constant 50 : index
    %179 = memref.load %arg1[%c50] : memref<76xf32, #tpu.memory_space<smem>>
    %180 = vector.broadcast %179 : f32 to vector<1x512xf32>
    %181 = arith.mulf %170, %180 : vector<1x512xf32>
    %182 = arith.addf %150, %181 : vector<1x512xf32>
    %c51 = arith.constant 51 : index
    %183 = memref.load %arg1[%c51] : memref<76xf32, #tpu.memory_space<smem>>
    %184 = vector.broadcast %183 : f32 to vector<1x512xf32>
    %185 = arith.mulf %170, %184 : vector<1x512xf32>
    %186 = arith.addf %154, %185 : vector<1x512xf32>
    %c5 = arith.constant 5 : index
    %187 = memref.load %arg1[%c5] : memref<76xf32, #tpu.memory_space<smem>>
    %188 = vector.broadcast %187 : f32 to vector<1x512xf32>
    %189 = arith.mulf %188, %17 : vector<1x512xf32>
    %c13 = arith.constant 13 : index
    %190 = memref.load %arg1[%c13] : memref<76xf32, #tpu.memory_space<smem>>
    %191 = vector.broadcast %190 : f32 to vector<1x512xf32>
    %192 = arith.mulf %191, %18 : vector<1x512xf32>
    %193 = arith.addf %189, %192 : vector<1x512xf32>
    %c21 = arith.constant 21 : index
    %194 = memref.load %arg1[%c21] : memref<76xf32, #tpu.memory_space<smem>>
    %195 = vector.broadcast %194 : f32 to vector<1x512xf32>
    %196 = arith.mulf %195, %13 : vector<1x512xf32>
    %197 = arith.addf %193, %196 : vector<1x512xf32>
    %c29 = arith.constant 29 : index
    %198 = memref.load %arg1[%c29] : memref<76xf32, #tpu.memory_space<smem>>
    %199 = vector.broadcast %198 : f32 to vector<1x512xf32>
    %200 = arith.addf %197, %199 : vector<1x512xf32>
    %cst_11 = arith.constant 0.000000e+00 : f32
    %201 = vector.broadcast %cst_11 : f32 to vector<1x512xf32>
    %202 = arith.maximumf %200, %201 : vector<1x512xf32>
    %c52 = arith.constant 52 : index
    %203 = memref.load %arg1[%c52] : memref<76xf32, #tpu.memory_space<smem>>
    %204 = vector.broadcast %203 : f32 to vector<1x512xf32>
    %205 = arith.mulf %202, %204 : vector<1x512xf32>
    %206 = arith.addf %174, %205 : vector<1x512xf32>
    %c53 = arith.constant 53 : index
    %207 = memref.load %arg1[%c53] : memref<76xf32, #tpu.memory_space<smem>>
    %208 = vector.broadcast %207 : f32 to vector<1x512xf32>
    %209 = arith.mulf %202, %208 : vector<1x512xf32>
    %210 = arith.addf %178, %209 : vector<1x512xf32>
    %c54 = arith.constant 54 : index
    %211 = memref.load %arg1[%c54] : memref<76xf32, #tpu.memory_space<smem>>
    %212 = vector.broadcast %211 : f32 to vector<1x512xf32>
    %213 = arith.mulf %202, %212 : vector<1x512xf32>
    %214 = arith.addf %182, %213 : vector<1x512xf32>
    %c55 = arith.constant 55 : index
    %215 = memref.load %arg1[%c55] : memref<76xf32, #tpu.memory_space<smem>>
    %216 = vector.broadcast %215 : f32 to vector<1x512xf32>
    %217 = arith.mulf %202, %216 : vector<1x512xf32>
    %218 = arith.addf %186, %217 : vector<1x512xf32>
    %c6 = arith.constant 6 : index
    %219 = memref.load %arg1[%c6] : memref<76xf32, #tpu.memory_space<smem>>
    %220 = vector.broadcast %219 : f32 to vector<1x512xf32>
    %221 = arith.mulf %220, %17 : vector<1x512xf32>
    %c14 = arith.constant 14 : index
    %222 = memref.load %arg1[%c14] : memref<76xf32, #tpu.memory_space<smem>>
    %223 = vector.broadcast %222 : f32 to vector<1x512xf32>
    %224 = arith.mulf %223, %18 : vector<1x512xf32>
    %225 = arith.addf %221, %224 : vector<1x512xf32>
    %c22 = arith.constant 22 : index
    %226 = memref.load %arg1[%c22] : memref<76xf32, #tpu.memory_space<smem>>
    %227 = vector.broadcast %226 : f32 to vector<1x512xf32>
    %228 = arith.mulf %227, %13 : vector<1x512xf32>
    %229 = arith.addf %225, %228 : vector<1x512xf32>
    %c30 = arith.constant 30 : index
    %230 = memref.load %arg1[%c30] : memref<76xf32, #tpu.memory_space<smem>>
    %231 = vector.broadcast %230 : f32 to vector<1x512xf32>
    %232 = arith.addf %229, %231 : vector<1x512xf32>
    %cst_12 = arith.constant 0.000000e+00 : f32
    %233 = vector.broadcast %cst_12 : f32 to vector<1x512xf32>
    %234 = arith.maximumf %232, %233 : vector<1x512xf32>
    %c56 = arith.constant 56 : index
    %235 = memref.load %arg1[%c56] : memref<76xf32, #tpu.memory_space<smem>>
    %236 = vector.broadcast %235 : f32 to vector<1x512xf32>
    %237 = arith.mulf %234, %236 : vector<1x512xf32>
    %238 = arith.addf %206, %237 : vector<1x512xf32>
    %c57 = arith.constant 57 : index
    %239 = memref.load %arg1[%c57] : memref<76xf32, #tpu.memory_space<smem>>
    %240 = vector.broadcast %239 : f32 to vector<1x512xf32>
    %241 = arith.mulf %234, %240 : vector<1x512xf32>
    %242 = arith.addf %210, %241 : vector<1x512xf32>
    %c58 = arith.constant 58 : index
    %243 = memref.load %arg1[%c58] : memref<76xf32, #tpu.memory_space<smem>>
    %244 = vector.broadcast %243 : f32 to vector<1x512xf32>
    %245 = arith.mulf %234, %244 : vector<1x512xf32>
    %246 = arith.addf %214, %245 : vector<1x512xf32>
    %c59 = arith.constant 59 : index
    %247 = memref.load %arg1[%c59] : memref<76xf32, #tpu.memory_space<smem>>
    %248 = vector.broadcast %247 : f32 to vector<1x512xf32>
    %249 = arith.mulf %234, %248 : vector<1x512xf32>
    %250 = arith.addf %218, %249 : vector<1x512xf32>
    %c7 = arith.constant 7 : index
    %251 = memref.load %arg1[%c7] : memref<76xf32, #tpu.memory_space<smem>>
    %252 = vector.broadcast %251 : f32 to vector<1x512xf32>
    %253 = arith.mulf %252, %17 : vector<1x512xf32>
    %c15 = arith.constant 15 : index
    %254 = memref.load %arg1[%c15] : memref<76xf32, #tpu.memory_space<smem>>
    %255 = vector.broadcast %254 : f32 to vector<1x512xf32>
    %256 = arith.mulf %255, %18 : vector<1x512xf32>
    %257 = arith.addf %253, %256 : vector<1x512xf32>
    %c23 = arith.constant 23 : index
    %258 = memref.load %arg1[%c23] : memref<76xf32, #tpu.memory_space<smem>>
    %259 = vector.broadcast %258 : f32 to vector<1x512xf32>
    %260 = arith.mulf %259, %13 : vector<1x512xf32>
    %261 = arith.addf %257, %260 : vector<1x512xf32>
    %c31 = arith.constant 31 : index
    %262 = memref.load %arg1[%c31] : memref<76xf32, #tpu.memory_space<smem>>
    %263 = vector.broadcast %262 : f32 to vector<1x512xf32>
    %264 = arith.addf %261, %263 : vector<1x512xf32>
    %cst_13 = arith.constant 0.000000e+00 : f32
    %265 = vector.broadcast %cst_13 : f32 to vector<1x512xf32>
    %266 = arith.maximumf %264, %265 : vector<1x512xf32>
    %c60 = arith.constant 60 : index
    %267 = memref.load %arg1[%c60] : memref<76xf32, #tpu.memory_space<smem>>
    %268 = vector.broadcast %267 : f32 to vector<1x512xf32>
    %269 = arith.mulf %266, %268 : vector<1x512xf32>
    %270 = arith.addf %238, %269 : vector<1x512xf32>
    %c61 = arith.constant 61 : index
    %271 = memref.load %arg1[%c61] : memref<76xf32, #tpu.memory_space<smem>>
    %272 = vector.broadcast %271 : f32 to vector<1x512xf32>
    %273 = arith.mulf %266, %272 : vector<1x512xf32>
    %274 = arith.addf %242, %273 : vector<1x512xf32>
    %c62 = arith.constant 62 : index
    %275 = memref.load %arg1[%c62] : memref<76xf32, #tpu.memory_space<smem>>
    %276 = vector.broadcast %275 : f32 to vector<1x512xf32>
    %277 = arith.mulf %266, %276 : vector<1x512xf32>
    %278 = arith.addf %246, %277 : vector<1x512xf32>
    %c63 = arith.constant 63 : index
    %279 = memref.load %arg1[%c63] : memref<76xf32, #tpu.memory_space<smem>>
    %280 = vector.broadcast %279 : f32 to vector<1x512xf32>
    %281 = arith.mulf %266, %280 : vector<1x512xf32>
    %282 = arith.addf %250, %281 : vector<1x512xf32>
    %cst_14 = arith.constant 0.000000e+00 : f32
    %283 = vector.broadcast %cst_14 : f32 to vector<1x512xf32>
    %284 = arith.maximumf %270, %283 : vector<1x512xf32>
    %cst_15 = arith.constant 0.000000e+00 : f32
    %285 = vector.broadcast %cst_15 : f32 to vector<1x512xf32>
    %286 = arith.maximumf %274, %285 : vector<1x512xf32>
    %cst_16 = arith.constant 0.000000e+00 : f32
    %287 = vector.broadcast %cst_16 : f32 to vector<1x512xf32>
    %288 = arith.maximumf %278, %287 : vector<1x512xf32>
    %cst_17 = arith.constant 0.000000e+00 : f32
    %289 = vector.broadcast %cst_17 : f32 to vector<1x512xf32>
    %290 = arith.maximumf %282, %289 : vector<1x512xf32>
    %c68 = arith.constant 68 : index
    %291 = memref.load %arg1[%c68] : memref<76xf32, #tpu.memory_space<smem>>
    %c69 = arith.constant 69 : index
    %292 = memref.load %arg1[%c69] : memref<76xf32, #tpu.memory_space<smem>>
    %293 = vector.broadcast %291 : f32 to vector<1x512xf32>
    %294 = vector.broadcast %292 : f32 to vector<1x512xf32>
    %295 = arith.select %6, %293, %294 : vector<1x512xi1>, vector<1x512xf32>
    %296 = arith.mulf %284, %295 : vector<1x512xf32>
    %c70 = arith.constant 70 : index
    %297 = memref.load %arg1[%c70] : memref<76xf32, #tpu.memory_space<smem>>
    %c71 = arith.constant 71 : index
    %298 = memref.load %arg1[%c71] : memref<76xf32, #tpu.memory_space<smem>>
    %299 = vector.broadcast %297 : f32 to vector<1x512xf32>
    %300 = vector.broadcast %298 : f32 to vector<1x512xf32>
    %301 = arith.select %6, %299, %300 : vector<1x512xi1>, vector<1x512xf32>
    %302 = arith.mulf %286, %301 : vector<1x512xf32>
    %303 = arith.addf %296, %302 : vector<1x512xf32>
    %c72 = arith.constant 72 : index
    %304 = memref.load %arg1[%c72] : memref<76xf32, #tpu.memory_space<smem>>
    %c73 = arith.constant 73 : index
    %305 = memref.load %arg1[%c73] : memref<76xf32, #tpu.memory_space<smem>>
    %306 = vector.broadcast %304 : f32 to vector<1x512xf32>
    %307 = vector.broadcast %305 : f32 to vector<1x512xf32>
    %308 = arith.select %6, %306, %307 : vector<1x512xi1>, vector<1x512xf32>
    %309 = arith.mulf %288, %308 : vector<1x512xf32>
    %310 = arith.addf %303, %309 : vector<1x512xf32>
    %c74 = arith.constant 74 : index
    %311 = memref.load %arg1[%c74] : memref<76xf32, #tpu.memory_space<smem>>
    %c75 = arith.constant 75 : index
    %312 = memref.load %arg1[%c75] : memref<76xf32, #tpu.memory_space<smem>>
    %313 = vector.broadcast %311 : f32 to vector<1x512xf32>
    %314 = vector.broadcast %312 : f32 to vector<1x512xf32>
    %315 = arith.select %6, %313, %314 : vector<1x512xi1>, vector<1x512xf32>
    %316 = arith.mulf %290, %315 : vector<1x512xf32>
    %317 = arith.addf %310, %316 : vector<1x512xf32>
    %c0_18 = arith.constant 0 : index
    %c0_19 = arith.constant 0 : index
    %318 = vector.load %arg4[%c0_18, %c0_19] : memref<1x512xf32, #tpu.memory_space<vmem>>, vector<1x512xf32>
    tpu.vector_store %arg4[%c0_18, %c0_19], %317 {strides = array<i32>} : memref<1x512xf32, #tpu.memory_space<vmem>>, vector<1x512xf32>,
    return
  }
  func.func @transform_0(%arg0: i32) -> i32 {
    %c0_i32 = arith.constant 0 : i32
    %c0_i32_0 = arith.constant 0 : i32
    return %c0_i32 : i32
  }
  func.func @transform_1(%arg0: i32) -> (i32, i32) {
    %c0_i32 = arith.constant 0 : i32
    %c0_i32_0 = arith.constant 0 : i32
    return %arg0, %c0_i32 : i32, i32
  }
  func.func @transform_2(%arg0: i32) -> (i32, i32) {
    %c0_i32 = arith.constant 0 : i32
    %c0_i32_0 = arith.constant 0 : i32
    return %arg0, %c0_i32 : i32, i32
  }
  func.func @transform_3(%arg0: i32) -> (i32, i32) {
    %c0_i32 = arith.constant 0 : i32
    %c0_i32_0 = arith.constant 0 : i32
    return %arg0, %c0_i32 : i32, i32
  }
}

</mosaic_0001>

<bundles_post_ra>
// kernel: tpu_custom_call.1
= control target key start
LH: loop header
LB: loop body
LE: loop exit
PB: predicated region body
PF: predicated region fallthrough
CT: control target
= control target key end

     0   :  { %s2490_s0 = inlined_call_operand.hbm [shape: f32[76], index: 0, kind: input, shape index: {}]   ;;  %s2491_s1 = inlined_call_operand.hbm [shape: f32[1,512], index: 1, kind: input, shape index: {}]   ;;  %s2492_s2 = inlined_call_operand.vmem [shape: f32[1,512], index: 2, kind: input, shape index: {}]   ;;  %s2493_s3 = inlined_call_operand.hbm [shape: f32[1,512], index: 3, kind: output, shape index: {}]  }
   0x1   :  { %2572 = sst [smem:[#allocation105_spill]] %s2493_s3 }
   0x2   :  { %8 = vsyncpa [#allocation5], 0 }
   0x3   :  { %9 = vsyncpa [#allocation3], 0 }
   0x4   :  { %10 = vsyncpa [#allocation4], 0  ;;  %s1165_s14 = scalar_lea.hbm %s2490_s0, 16 }
   0x5   :  { %p1166_p0 = scmp.ne.s32.totalorder %s2490_s0, %s1165_s14  ;;  %p1169_p1 = scmp.lt.u32.totalorder %s1165_s14, %s2490_s0 }
   0x7   :  { %p1171_p2 = pnand %p1169_p1, %p1166_p0 }
   0x9   :  { %1174 = shalt.err (!%p1171_p2)
}
   0xa   :  { %s1225_s19 = smov [#allocation2]   ;;  %s1226_s22 = smov [#allocation6]  }
   0xb   :  { %18 = dma.hbm_to_smem %s2490_s0, 16, %s1225_s19, [#allocation5]  }
   0xc   :  { %s25_s23 = sshll.u32 %s1226_s22, 4  ;;  %s1175_s26 = scalar_lea.hbm %s2491_s1, 64  ;;  %s26_s23 = int_to_ptr.vmem [resolvable:$true] %s25_s23 }
   0xd   :  { %p1176_p3 = scmp.ne.s32.totalorder %s2491_s1, %s1175_s26  ;;  %p1179_p4 = scmp.lt.u32.totalorder %s1175_s26, %s2491_s1 }
   0xf   :  { %p1181_p5 = pnand %p1179_p4, %p1176_p3 }
  0x11   :  { %1184 = shalt.err (!%p1181_p5)
}
  0x12   :  { %s1185_s4 = scalar_lea.vmem %s26_s23, 64  ;;  %p1190_p7 = scmp.lt.s32.totalorder %s26_s23, %s26_s23 }
  0x13   :  { %p1186_p6 = scmp.ne.s32.totalorder %s26_s23, %s1185_s4  ;;  %p1191_p8 = scmp.lt.s32.totalorder %s1185_s4, %s1185_s4 }
  0x15   :  { %p1192_p9 = por %p1191_p8, %p1190_p7 }
  0x17   :  { %p1193_p10 = pnand %p1192_p9, %p1186_p6 }
  0x19   :  { %1196 = shalt.err (!%p1193_p10)
}
  0x1a   :  { %28 = dma.hbm_to_vmem [thread:$0]  %s2491_s1, 64, %s26_s23, [#allocation3]  }
  0x1b   :  { %1219 = dma.done.wait [#allocation5], 16  }
  0x1c   :  { %1220 = vsyncadd [#allocation5], 4294967280 }
  0x1d   :  { %1221 = dma.done.wait [#allocation3], 64  }
  0x1e   :  { %1222 = vsyncadd [#allocation3], 4294967232 }
  0x1f   :  { %37 = sfence }
  0x20   :  { %v38_v0 = vld [vmem:[#allocation6] sm:$0xf]  ;;  %v39_v1 = vld [vmem:[%s2492_s2] sm:$0xf]  ;;  %v2503_v2 = vlaneseq  ;;  %s1227_s1 = smov 127   ;;  %s1228_s2 = smov 1  }
  0x21   :  { %v53_v3 = vsub.f32 %v39_v1, %v38_v0  ;;  %s1323_s8 = sld [smem:[#allocation2 + $0x8]]  ;;  %s1325_s9 = sld [smem:[#allocation2 + $0x9]]  ;;  %v1229_v19 = vmov 1966171168   ;;  %v2605_v51 = vmov 0  ;;  %v2608_v52 = vmov 0 }
  0x22   :  { %v1279_v4 = vshrl.u32 %v2503_v2, 7  ;;  %s1327_s10 = sld [smem:[#allocation2 + $0xa]]  ;;  %s1329_s11 = sld [smem:[#allocation2 + $0xb]]  ;;  %v1368_v18 = vand.u32 127, %v2503_v2  ;;  %v113_v20 = vunpack.c.l.s4 %v1229_v19  ;;  %v2612_v53 = vmov 0 }
  0x23   :  { %v1281_v5 = vmul.f32 %v53_v3, %v53_v3  ;;  %s1331_s12 = sld [smem:[#allocation2 + $0xc]]  ;;  %s1333_s13 = sld [smem:[#allocation2 + $0xd]]  ;;  %v2616_v54 = vmov 0 }
  0x24   :  { %v1284_v6 = vsub.s32 2, %v1279_v4  ;;  %v1287_v7 = vsub.s32 0, %v1279_v4  ;;  %v1290_v8 = vsub.s32 3, %v1279_v4  ;;  %v1293_v9 = vsub.s32 1, %v1279_v4  ;;  %s1335_s14 = sld [smem:[#allocation2 + $0xe]]  ;;  %s1337_s15 = sld [smem:[#allocation2 + $0xf]] }
  0x25   :  { %s1339_s16 = sld [smem:[#allocation2]]  ;;  %s1341_s17 = sld [smem:[#allocation2 + $0x1]]  ;;  %v42_v21 = vadd.s32 128, %v1368_v18  ;;  %v43_v22 = vadd.s32 256, %v1368_v18  ;;  %v44_v23 = vadd.s32 384, %v1368_v18  ;;  %v114_v24 = vunpack.c.0.s8 %v113_v20 }
  0x26   :  { %v67_v10 = vrot.slane %v1281_v5, %v1284_v6  ;;  %v59_v11 = vrot.slane %v1281_v5, %v1287_v7  ;;  %v71_v12 = vrot.slane %v1281_v5, %v1290_v8  ;;  %v63_v13 = vrot.slane %v1281_v5, %v1293_v9  ;;  %s1343_s18 = sld [smem:[#allocation2 + $0x2]]  ;;  %s1345_s19 = sld [smem:[#allocation2 + $0x3]] }
  0x27   :  { %v1304_v14 = vrot.slane %v38_v0, %v1293_v9  ;;  %v1307_v15 = vrot.slane %v38_v0, %v1287_v7  ;;  %v1312_v16 = vrot.slane %v38_v0, %v1290_v8  ;;  %v1315_v17 = vrot.slane %v38_v0, %v1284_v6  ;;  %s1347_s20 = sld [smem:[#allocation2 + $0x4]]  ;;  %s1349_s21 = sld [smem:[#allocation2 + $0x5]] }
  0x28   :  { %80 = vrot.lane.b32.xlu1 %v67_v10, %s1227_s1  ;;  %76 = vrot.lane.b32.xlu0 %v59_v11, %s1227_s1  ;;  %s1351_s22 = sld [smem:[#allocation2 + $0x6]]  ;;  %s1353_s23 = sld [smem:[#allocation2 + $0x7]]  ;;  %v46_v25 = vand.u32 1, %v42_v21  ;;  %v45_v26 = vand.u32 1, %v1368_v18  ;;  %v47_v27 = vand.u32 1, %v43_v22  ;;  %v48_v28 = vand.u32 1, %v44_v23 }
  0x29   :  { %2573 = vst [vmem:[#allocation11_spill] sm:$0xff] %v1312_v16  ;;  %s1355_s24 = sld [smem:[#allocation2 + $0x10]]  ;;  %s1357_s25 = sld [smem:[#allocation2 + $0x11]]  ;;  %v1415_v29 = vsub.s32 %v114_v24, %v1279_v4  ;;  %v1418_v30 = vstv %s1323_s8  ;;  %v1421_v31 = vstv %s1325_s9  ;;  %v1424_v32 = vstv %s1327_s10 }
  0x2a   :  { %s1359_s26 = sld [smem:[#allocation2 + $0x12]]  ;;  %s1361_s27 = sld [smem:[#allocation2 + $0x13]]  ;;  %v1431_v33 = vstv %s1329_s11  ;;  %v1434_v34 = vstv %s1331_s12  ;;  %v1437_v35 = vstv %s1333_s13  ;;  %v1440_v36 = vstv %s1335_s14 }
  0x2b   :  { %s1363_s28 = sld [smem:[#allocation2 + $0x14]]  ;;  %s1365_s29 = sld [smem:[#allocation2 + $0x15]]  ;;  %2593 = vst [vmem:[#allocation31_spill] sm:$0xff] %v1415_v29  ;;  %vm97_vm0 = vcmp.lt.s32.totalorder %v1368_v18, 1  ;;  %v1452_v39 = vstv %s1337_s15  ;;  %v1455_v40 = vstv %s1339_s16  ;;  %v1458_v41 = vstv %s1341_s17 }
  0x2c   :  { %82 = vrot.lane.b32.xlu1 %v71_v12, %s1227_s1  ;;  %78 = vrot.lane.b32.xlu0 %v63_v13, %s1227_s1  ;;  %s1370_s30 = sld [smem:[#allocation2 + $0x16]]  ;;  %s1372_s4 = sld [smem:[#allocation2 + $0x17]]  ;;  %2594 = vst [vmem:[#allocation32_spill] sm:$0xff] %v1455_v40  ;;  %2595 = vst [vmem:[#allocation33_spill] sm:$0xff] %v1458_v41  ;;  %v1461_v42 = vstv %s1343_s18  ;;  %vm84_vm1 = vcmp.lt.s32.totalorder %v1368_v18, 127  ;;  %v1469_v43 = vstv %s1345_s19  ;;  %vm1494_vm2 = vcmp.eq.s32.totalorder %v46_v25, 0 }
  0x2d   :  { %s1374_s0 = sld [smem:[#allocation2 + $0x18]]  ;;  %s1376_s5 = sld [smem:[#allocation2 + $0x19]]  ;;  %2596 = vst [vmem:[#allocation34_spill] sm:$0xff] %v1461_v42  ;;  %2597 = vst [vmem:[#allocation35_spill] sm:$0xff] %v1469_v43  ;;  %v1472_v44 = vstv %s1347_s20  ;;  %v1475_v45 = vstv %s1349_s21  ;;  %v2606_v51 = vsel %vm1494_vm2, 4294967295, %v2605_v51  ;;  %vm1498_vm3 = vcmp.eq.s32.totalorder %v45_v26, 0 }
  0x2e   :  { %s1378_s6 = sld [smem:[#allocation2 + $0x20]]  ;;  %s1380_s7 = sld [smem:[#allocation2 + $0x21]]  ;;  %2598 = vst [vmem:[#allocation36_spill] sm:$0xff] %v1472_v44  ;;  %2599 = vst [vmem:[#allocation37_spill] sm:$0xff] %v1475_v45  ;;  %v1478_v46 = vstv %s1351_s22  ;;  %v1488_v50 = vstv %s1353_s23  ;;  %v2609_v52 = vsel %vm1498_vm3, 4294967295, %v2608_v52  ;;  %vm1502_vm4 = vcmp.eq.s32.totalorder %v47_v27, 0 }
  0x2f   :  { %2574 = sst [smem:[#allocation12_spill]] %s1355_s24  ;;  %s1387_s3 = sld [smem:[#allocation2 + $0x1c]]  ;;  %2600 = vst [vmem:[#allocation38_spill] sm:$0xff] %v1478_v46  ;;  %2607 = vst [vmem:[#allocation39_spill] sm:$0xff] %v2606_v51  ;;  %v2613_v53 = vsel %vm1502_vm4, 4294967295, %v2612_v53  ;;  %vm1506_vm5 = vcmp.eq.s32.totalorder %v48_v28, 0 }
  0x30   :  { %91 = vrot.lane.b32.xlu1 %v63_v13, %s1228_s2  ;;  %89 = vrot.lane.b32.xlu0 %v59_v11, %s1228_s2  ;;  %2575 = sst [smem:[#allocation13_spill]] %s1357_s25  ;;  %s1444_s9 = sld [smem:[#allocation2 + $0x2a]]  ;;  %2610 = vst [vmem:[#allocation40_spill] sm:$0xff] %v2609_v52  ;;  %2614 = vst [vmem:[#allocation41_spill] sm:$0xff] %v2613_v53  ;;  %v2617_v54 = vsel %vm1506_vm5, 4294967295, %v2616_v54 }
  0x31   :  { %2576 = sst [smem:[#allocation14_spill]] %s1359_s26  ;;  %s1442_s8 = sld [smem:[#allocation2 + $0x29]]  ;;  %2618 = vst [vmem:[#allocation42_spill] sm:$0xff] %v2617_v54 }
  0x32   :  { %2577 = sst [smem:[#allocation15_spill]] %s1361_s27  ;;  %s1465_s11 = sld [smem:[#allocation2 + $0x2c]] }
  0x33   :  { %2578 = sst [smem:[#allocation16_spill]] %s1363_s28  ;;  %s1463_s10 = sld [smem:[#allocation2 + $0x2b]]  ;;  %v1519_v61 = vstv %s1374_s0 }
  0x34   :  { %95 = vrot.lane.b32.xlu1 %v71_v12, %s1228_s2  ;;  %93 = vrot.lane.b32.xlu0 %v67_v10, %s1228_s2  ;;  %2579 = sst [smem:[#allocation17_spill]] %s1365_s29  ;;  %s1482_s14 = sld [smem:[#allocation2 + $0x2e]]  ;;  %v1522_v62 = vstv %s1378_s6 }
  0x35   :  { %2580 = sst [smem:[#allocation18_spill]] %s1370_s30  ;;  %s1389_s30 = sld [smem:[#allocation2 + $0x1d]]  ;;  %v1540_v10 = vstv %s1387_s3 }
  0x36   :  { %2581 = sst [smem:[#allocation19_spill]] %s1372_s4  ;;  %s1393_s4 = sld [smem:[#allocation2 + $0x1e]]  ;;  %v1599_v57 = vstv %s1444_s9 }
  0x37   :  { %2582 = sst [smem:[#allocation20_spill]] %s1376_s5  ;;  %s1480_s13 = sld [smem:[#allocation2 + $0x2d]]  ;;  %v1596_v58 = vstv %s1442_s8  ;;  %2640 = vst [vmem:[#allocation55_spill] sm:$0xff] %v1599_v57 }
  0x38   :  { %166 = vrot.lane.b32.xlu1 %v1304_v14, %s1227_s1  ;;  %164 = vrot.lane.b32.xlu0 %v1307_v15, %s1227_s1  ;;  %2583 = sst [smem:[#allocation21_spill]] %s1380_s7  ;;  %s1395_s5 = sld [smem:[#allocation2 + $0x40]]  ;;  %2639 = vst [vmem:[#allocation54_spill] sm:$0xff] %v1596_v58  ;;  %v1609_v55 = vstv %s1465_s11 }
  0x39   :  { %s1401_s7 = sld [smem:[#allocation2 + $0x43]]  ;;  %s1490_s15 = sld [smem:[#allocation2 + $0x2f]]  ;;  %v1602_v56 = vstv %s1463_s10  ;;  %2642 = vst [vmem:[#allocation57_spill] sm:$0xff] %v1609_v55 }
  0x3a   :  { %s2602_s16 = sld [smem:[#allocation20_spill]]  ;;  %s2604_s18 = sld [smem:[#allocation19_spill]]  ;;  %2641 = vst [vmem:[#allocation56_spill] sm:$0xff] %v1602_v56  ;;  %v1615_v48 = vstv %s1482_s14 }
  0x3b   :  { %2586 = sst [smem:[#allocation24_spill]] %s1389_s30  ;;  %s1403_s30 = sld [smem:[#allocation2 + $0x22]]  ;;  %2644 = vst [vmem:[#allocation59_spill] sm:$0xff] %v1615_v48 }
  0x3c   :  { %170 = vrot.lane.b32.xlu1 %v1312_v16, %s1227_s1  ;;  %168 = vrot.lane.b32.xlu0 %v1315_v17, %s1227_s1  ;;  %s1382_s1 = sld [smem:[#allocation2 + $0x1a]]  ;;  %2587 = sst [smem:[#allocation25_spill]] %s1393_s4 }
  0x3d   :  { %s1406_s4 = sld [smem:[#allocation2 + $0x23]]  ;;  %s1492_s17 = sld [smem:[#allocation2 + $0x30]]  ;;  %v1612_v49 = vstv %s1480_s13 }
  0x3e   :  { %2588 = sst [smem:[#allocation26_spill]] %s1395_s5  ;;  %s1408_s5 = sld [smem:[#allocation2 + $0x24]]  ;;  %2643 = vst [vmem:[#allocation58_spill] sm:$0xff] %v1612_v49 }
  0x3f   :  { %2591 = sst [smem:[#allocation29_spill]] %s1401_s7  ;;  %s1428_s7 = sld [smem:[#allocation2 + $0x28]]  ;;  %v1618_v47 = vstv %s1490_s15 }
  0x40   :  { %178 = vrot.lane.b32.xlu1 %v1304_v14, %s1228_s2  ;;  %176 = vrot.lane.b32.xlu0 %v1307_v15, %s1228_s2  ;;  %s2611_s19 = sld [smem:[#allocation21_spill]]  ;;  %s2620_s22 = sld [smem:[#allocation24_spill]]  ;;  %v1525_v63 = vstv %s2602_s16  ;;  %2645 = vst [vmem:[#allocation60_spill] sm:$0xff] %v1618_v47 }
  0x41   :  { %s2621_s23 = sld [smem:[#allocation25_spill]]  ;;  %s1514_s26 = sld [smem:[#allocation2 + $0x31]]  ;;  %v1561_v20 = vstv %s1403_s30 }
  0x42   :  { %2584 = sst [smem:[#allocation22_spill]] %s1382_s1  ;;  %s1397_s1 = sld [smem:[#allocation2 + $0x41]]  ;;  %2629 = vst [vmem:[#allocation45_spill] sm:$0xff] %v1561_v20 }
  0x43   :  { %2603 = sst [smem:[#allocation20_spill]] %s1492_s17  ;;  %s2615_s20 = sld [smem:[#allocation22_spill]]  ;;  %v1567_v22 = vstv %s1406_s4 }
  0x44   :  { %182 = vrot.lane.b32.xlu1 %v1312_v16, %s1228_s2  ;;  %180 = vrot.lane.b32.xlu0 %v1315_v17, %s1228_s2  ;;  %s1384_s2 = sld [smem:[#allocation2 + $0x1b]]  ;;  %2592 = sst [smem:[#allocation30_spill]] %s1408_s5  ;;  %2631 = vst [vmem:[#allocation47_spill] sm:$0xff] %v1567_v22 }
  0x45   :  { %s1426_s5 = sld [smem:[#allocation2 + $0x27]]  ;;  %s2622_s25 = sld [smem:[#allocation26_spill]]  ;;  %v1593_v0 = vstv %s1428_s7 }
  0x46   :  { %s1516_s24 = sld [smem:[#allocation2 + $0x32]]  ;;  %s2625_s12 = sld [smem:[#allocation29_spill]]  ;;  %v1531_v1 = vstv %s2611_s19  ;;  %v1545_v11 = vstv %s2620_s22  ;;  %2638 = vst [vmem:[#allocation53_spill] sm:$0xff] %v1593_v0 }
  0x47   :  { %s1528_s29 = sld [smem:[#allocation2 + $0x33]]  ;;  %s2626_s0 = sld [smem:[#allocation30_spill]]  ;;  %v1548_v12 = vstv %s2621_s23  ;;  %v1630_v58 = vstv %s1514_s26 }
  0x48   :  { %2589 = sst [smem:[#allocation27_spill]] %s1397_s1  ;;  %s1410_s1 = sld [smem:[#allocation2 + $0x25]]  ;;  %2647 = vst [vmem:[#allocation62_spill] sm:$0xff] %v1630_v58 }
  0x49   :  { %s2623_s17 = sld [smem:[#allocation27_spill]]  ;;  %v1534_v3 = vstv %s2615_s20  ;;  %s1542_s28 = sld [smem:[#allocation2 + $0x34]] }
  0x4a   :  { %2585 = sst [smem:[#allocation23_spill]] %s1384_s2  ;;  %s1399_s2 = sld [smem:[#allocation2 + $0x42]] }
  0x4b   :  { %s2619_s21 = sld [smem:[#allocation23_spill]]  ;;  %v1551_v13 = vstv %s2622_s25  ;;  %s1556_s6 = sld [smem:[#allocation2 + $0x35]]  ;;  %v1586_v2 = vstv %s1426_s5 }
  0x4c   :  { %2627 = vst [vmem:[#allocation43_spill] sm:$0xff] %v1551_v13  ;;  %s1558_s16 = sld [smem:[#allocation2 + $0x36]]  ;;  %v1570_v23 = vstv %s2625_s12  ;;  %s1572_s3 = sld [smem:[#allocation2 + $0x37]]  ;;  %2636 = vst [vmem:[#allocation52_spill] sm:$0xff] %v1586_v2  ;;  %v1633_v0 = vstv %s1516_s24 }
  0x4d   :  { %2632 = vst [vmem:[#allocation48_spill] sm:$0xff] %v1570_v23  ;;  %s1574_s25 = sld [smem:[#allocation2 + $0x38]]  ;;  %v1577_v26 = vstv %s2626_s0  ;;  %s1588_s30 = sld [smem:[#allocation2 + $0x39]]  ;;  %2648 = vst [vmem:[#allocation63_spill] sm:$0xff] %v1633_v0  ;;  %v1649_v49 = vstv %s1528_s29 }
  0x4e   :  { %2633 = vst [vmem:[#allocation49_spill] sm:$0xff] %v1577_v26  ;;  %v1580_v27 = vstv %s1410_s1  ;;  %s1590_s4 = sld [smem:[#allocation2 + $0x3a]]  ;;  %s1604_s1 = sld [smem:[#allocation2 + $0x3b]]  ;;  %2649 = vst [vmem:[#allocation64_spill] sm:$0xff] %v1649_v49 }
  0x4f   :  { %v1554_v19 = vstv %s2623_s17  ;;  %2634 = vst [vmem:[#allocation50_spill] sm:$0xff] %v1580_v27  ;;  %s1620_s5 = sld [smem:[#allocation2 + $0x3c]]  ;;  %s1622_s7 = sld [smem:[#allocation2 + $0x3d]]  ;;  %v1669_v27 = vstv %s1542_s28 }
  0x50   :  { %2590 = sst [smem:[#allocation28_spill]] %s1399_s2  ;;  %s1412_s2 = sld [smem:[#allocation2 + $0x26]]  ;;  %2628 = vst [vmem:[#allocation44_spill] sm:$0xff] %v1554_v19  ;;  %2650 = vst [vmem:[#allocation65_spill] sm:$0xff] %v1669_v27 }
  0x51   :  { %s2624_s27 = sld [smem:[#allocation28_spill]]  ;;  %v1537_v4 = vstv %s2619_s21  ;;  %s1635_s8 = sld [smem:[#allocation2 + $0x3e]] }
  0x52   :  { %s1637_s9 = sld [smem:[#allocation2 + $0x3f]]  ;;  %s2680_s24 = sld [smem:[#allocation12_spill]] }
  0x53   :  { %s2681_s26 = sld [smem:[#allocation13_spill]]  ;;  %s2682_s28 = sld [smem:[#allocation14_spill]] }
  0x54   :  { %s2683_s29 = sld [smem:[#allocation15_spill]]  ;;  %s2684_s10 = sld [smem:[#allocation16_spill]] }
  0x55   :  { %s2685_s11 = sld [smem:[#allocation17_spill]]  ;;  %s2686_s12 = sld [smem:[#allocation18_spill]] }
  0x56   :  { %v1583_v28 = vstv %s1412_s2  ;;  %s1606_s2 = sld [smem:[#allocation2 + $0x1f]]  ;;  %s2353_s13 = sld [smem:[#allocation2 + $0x44]] }
  0x57   :  { %v1564_v21 = vstv %s2624_s27  ;;  %2635 = vst [vmem:[#allocation51_spill] sm:$0xff] %v1583_v28  ;;  %s2637_s27 = sld [smem:[#allocation20_spill]]  ;;  %s2363_s14 = sld [smem:[#allocation2 + $0x45]] }
  0x58   :  { %2630 = vst [vmem:[#allocation46_spill] sm:$0xff] %v1564_v21  ;;  %s2365_s15 = sld [smem:[#allocation2 + $0x46]]  ;;  %s2430_s17 = sld [smem:[#allocation2 + $0x47]] }
  0x59   :  { %s2438_s19 = sld [smem:[#allocation2 + $0x49]]  ;;  %s2440_s20 = sld [smem:[#allocation2 + $0x4a]] }
  0x5a   :  { %s1156_s21 = sld [smem:[#allocation2 + $0x4b]]  ;;  %s1230_s22 = smov [#allocation7]  }
  0x5b   :  { %s1072_s23 = sshll.u32 %s1230_s22, 4  ;;  %s1073_s23 = int_to_ptr.vmem [resolvable:$true] %s1072_s23 }
  0x5c   :  { %s1197_s0 = scalar_lea.vmem %s1073_s23, 64  ;;  %p1202_p12 = scmp.lt.s32.totalorder %s1073_s23, %s1073_s23 }
  0x5d   :  { %v1627_v57 = vstv %s2637_s27  ;;  %p1198_p11 = scmp.ne.s32.totalorder %s1073_s23, %s1197_s0  ;;  %p1203_p13 = scmp.lt.s32.totalorder %s1197_s0, %s1197_s0 }
  0x5e   :  { %2646 = vst [vmem:[#allocation61_spill] sm:$0xff] %v1627_v57 }
  0x5f   :  { %p1204_p0 = por %p1203_p13, %p1202_p12 }
  0x61   :  { %p1205_p1 = pnand %p1204_p0, %p1198_p11 }
  0x9a   :  { %v1446_v37 = vpop.permute.xlu1 %80  ;;  %v1448_v38 = vpop.permute.xlu0 %76 }
  0x9e   :  { %v83_v59 = vpop.permute.xlu1 %82  ;;  %v79_v60 = vpop.permute.xlu0 %78 }
  0x9f   :  { %v85_v47 = vsel %vm84_vm1, %v1446_v37, %v83_v59  ;;  %v88_v48 = vsel %vm84_vm1, %v83_v59, %v1448_v38  ;;  %v86_v58 = vsel %vm84_vm1, %v79_v60, %v1446_v37  ;;  %v87_v55 = vsel %vm84_vm1, %v1448_v38, %v79_v60 }
  0xa2   :  { %v92_v24 = vpop.permute.xlu1 %91  ;;  %v90_v25 = vpop.permute.xlu0 %89 }
  0xa3   :  { %v100_v56 = vsel %vm97_vm0, %v90_v25, %v92_v24 }
  0xa4   :  { %v103_v28 = vsel %vm1494_vm2, %v86_v58, %v100_v56  ;;  %v1681_v58 = vstv %s1574_s25 }
  0xa5   :  { %2654 = vst [vmem:[#allocation69_spill] sm:$0xff] %v1681_v58  ;;  %v1703_v58 = vstv %s1620_s5 }
  0xa6   :  { %v96_v57 = vpop.permute.xlu1 %95  ;;  %v94_v0 = vpop.permute.xlu0 %93  ;;  %2659 = vst [vmem:[#allocation74_spill] sm:$0xff] %v1703_v58 }
  0xa7   :  { %v101_v2 = vsel %vm97_vm0, %v96_v57, %v90_v25  ;;  %v98_v59 = vsel %vm97_vm0, %v94_v0, %v96_v57  ;;  %v99_v37 = vsel %vm97_vm0, %v92_v24, %v94_v0  ;;  %v1672_v0 = vstv %s1556_s6 }
  0xa8   :  { %v102_v49 = vsel %vm1498_vm3, %v87_v55, %v101_v2  ;;  %v104_v38 = vsel %vm1502_vm4, %v85_v47, %v99_v37  ;;  %v105_v60 = vsel %vm1506_vm5, %v88_v48, %v98_v59  ;;  %2651 = vst [vmem:[#allocation66_spill] sm:$0xff] %v1672_v0  ;;  %v1675_v55 = vstv %s1558_s16 }
  0xa9   :  { %v110_v25 = vcombine.low %v102_v49, %v103_v28  ;;  %v111_v57 = vcombine.low %v104_v38, %v105_v60  ;;  %2652 = vst [vmem:[#allocation67_spill] sm:$0xff] %v1675_v55  ;;  %v1678_v47 = vstv %s1572_s3  ;;  %v1684_v48 = vstv %s1588_s30 }
  0xaa   :  { %v167_v56 = vpop.permute.xlu1 %166  ;;  %v165_v2 = vpop.permute.xlu0 %164  ;;  %2653 = vst [vmem:[#allocation68_spill] sm:$0xff] %v1678_v47  ;;  %2655 = vst [vmem:[#allocation70_spill] sm:$0xff] %v1684_v48  ;;  %v1691_v59 = vstv %s1590_s4  ;;  %v1697_v38 = vstv %s1604_s1  ;;  %v1700_v60 = vstv %s1606_s2  ;;  %v1706_v47 = vstv %s1622_s7 }
  0xab   :  { %v118_v49 = vrot.slane %v110_v25, %v1415_v29  ;;  %v125_v24 = vrot.slane %v111_v57, %v1415_v29  ;;  %v174_v28 = vsel %vm84_vm1, %v165_v2, %v167_v56  ;;  %2656 = vst [vmem:[#allocation71_spill] sm:$0xff] %v1691_v59  ;;  %2657 = vst [vmem:[#allocation72_spill] sm:$0xff] %v1697_v38  ;;  %v1709_v25 = vstv %s1635_s8 }
  0xac   :  { %v192_v37 = vsel %vm1498_vm3, %v174_v28, %v1307_v15  ;;  %2658 = vst [vmem:[#allocation73_spill] sm:$0xff] %v1700_v60  ;;  %2660 = vst [vmem:[#allocation75_spill] sm:$0xff] %v1706_v47  ;;  %v1712_v57 = vstv %s1637_s9 }
  0xad   :  { %v126_v48 = vcombine.low %v118_v49, %v125_v24  ;;  %2661 = vst [vmem:[#allocation76_spill] sm:$0xff] %v1709_v25  ;;  %2662 = vst [vmem:[#allocation77_spill] sm:$0xff] %v1712_v57  ;;  %v1715_v55 = vmul.f32 %v1418_v30, %v192_v37  ;;  %v1718_v59 = vmul.f32 %v1421_v31, %v192_v37 }
  0xae   :  { %v1721_v28 = vmul.f32 %v1424_v32, %v192_v37  ;;  %v1724_v60 = vmul.f32 %v1431_v33, %v192_v37  ;;  %v171_v58 = vpop.permute.xlu1 %170  ;;  %v169_v49 = vpop.permute.xlu0 %168  ;;  %v1728_v25 = vmul.f32 %v1434_v34, %v192_v37  ;;  %v1735_v38 = vmul.f32 %v1437_v35, %v192_v37 }
  0xaf   :  { %v133_v24 = vrot.slane %v126_v48, %v1415_v29  ;;  %v175_v57 = vsel %vm84_vm1, %v171_v58, %v165_v2  ;;  %v172_v47 = vsel %vm84_vm1, %v169_v49, %v171_v58  ;;  %v1738_v0 = vmul.f32 %v1440_v36, %v192_v37 }
  0xb0   :  { %v1741_v27 = vmul.f32 %v1452_v39, %v192_v37  ;;  %v195_v48 = vsel %vm1506_vm5, %v175_v57, %v1312_v16  ;;  %v173_v58 = vsel %vm84_vm1, %v167_v56, %v169_v49  ;;  %v194_v26 = vsel %vm1502_vm4, %v172_v47, %v1315_v17 }
  0xb1   :  { %v1747_v29 = vadd.f32 %v133_v24, %v1281_v5  ;;  %v1750_v2 = vmul.f32 %v1418_v30, %v195_v48  ;;  %v1758_v37 = vmul.f32 %v1421_v31, %v195_v48  ;;  %v1761_v23 = vmul.f32 %v1424_v32, %v195_v48 }
  0xb2   :  { %v1764_v57 = vmul.f32 %v1431_v33, %v195_v48  ;;  %v1767_v5 = vmul.f32 %v1434_v34, %v195_v48  ;;  %v179_v24 = vpop.permute.xlu1 %178  ;;  %v177_v21 = vpop.permute.xlu0 %176  ;;  %v1772_v47 = vmul.f32 %v1437_v35, %v195_v48  ;;  %v1775_v49 = vmul.f32 %v1440_v36, %v195_v48 }
  0xb3   :  { %2663 = vst [vmem:[#allocation78_spill] sm:$0xff] %v1750_v2  ;;  %2664 = vst [vmem:[#allocation79_spill] sm:$0xff] %v1758_v37  ;;  %1163 = vrsqrt.f32 %v1747_v29  ;;  %v141_v56 = vand.u32 2147483648, %v1747_v29  ;;  %v1778_v22 = vmul.f32 %v1452_v39, %v195_v48  ;;  %v193_v20 = vsel %vm1494_vm2, %v173_v58, %v1304_v14 }
  0xb4   :  { %2665 = vst [vmem:[#allocation80_spill] sm:$0xff] %v1761_v23  ;;  %2666 = vst [vmem:[#allocation81_spill] sm:$0xff] %v1764_v57  ;;  %v1784_v19 = vmul.f32 %v1418_v30, %v194_v26  ;;  %v1787_v13 = vmul.f32 %v1421_v31, %v194_v26  ;;  %v401_v57 = vmul.f32 %v1424_v32, %v193_v20  ;;  %vm138_vm6 = vcmp.eq.f32.partialorder %v1747_v29, inf }
  0xb5   :  { %2667 = vst [vmem:[#allocation82_spill] sm:$0xff] %v1767_v5  ;;  %2668 = vst [vmem:[#allocation83_spill] sm:$0xff] %v1772_v47  ;;  %v209_v5 = vmul.f32 %v1418_v30, %v193_v20  ;;  %v307_v47 = vmul.f32 %v1421_v31, %v193_v20  ;;  %v495_v48 = vmul.f32 %v1431_v33, %v193_v20  ;;  %vm140_vm7 = vcmp.eq.f32.partialorder %v1747_v29, 0.0 }
  0xb6   :  { %2669 = vst [vmem:[#allocation84_spill] sm:$0xff] %v1775_v49  ;;  %2670 = vst [vmem:[#allocation85_spill] sm:$0xff] %v1778_v22  ;;  %v1793_v49 = vmul.f32 %v1424_v32, %v194_v26  ;;  %v1797_v22 = vmul.f32 %v1431_v33, %v194_v26  ;;  %v589_v58 = vmul.f32 %v1434_v34, %v193_v20  ;;  %v183_v37 = vpop.permute.xlu1 %182  ;;  %v181_v2 = vpop.permute.xlu0 %180 }
  0xb7   :  { %2671 = vst [vmem:[#allocation86_spill] sm:$0xff] %v1784_v19  ;;  %2672 = vst [vmem:[#allocation87_spill] sm:$0xff] %v1787_v13  ;;  %v1801_v23 = vmul.f32 %v1434_v34, %v194_v26  ;;  %v683_v30 = vmul.f32 %v1437_v35, %v193_v20  ;;  %v1806_v31 = vmul.f32 %v1437_v35, %v194_v26 }
  0xb8   :  { %2673 = vst [vmem:[#allocation88_spill] sm:$0xff] %v1793_v49  ;;  %2674 = vst [vmem:[#allocation89_spill] sm:$0xff] %v1797_v22  ;;  %v777_v32 = vmul.f32 %v1440_v36, %v193_v20  ;;  %v1810_v49 = vmul.f32 %v1440_v36, %v194_v26  ;;  %v871_v33 = vmul.f32 %v1452_v39, %v193_v20 }
  0xb9   :  { %2675 = vst [vmem:[#allocation90_spill] sm:$0xff] %v1801_v23  ;;  %2676 = vst [vmem:[#allocation91_spill] sm:$0xff] %v1806_v31  ;;  %v1815_v34 = vmul.f32 %v1452_v39, %v194_v26  ;;  %v186_v23 = vsel %vm97_vm0, %v177_v21, %v179_v24  ;;  %v187_v22 = vsel %vm97_vm0, %v183_v37, %v177_v21 }
  0xba   :  { %2677 = vst [vmem:[#allocation92_spill] sm:$0xff] %v1810_v49  ;;  %v189_v35 = vsel %vm1494_vm2, %v1304_v14, %v186_v23  ;;  %v1827_v36 = vsel %vm1498_vm3, %v1307_v15, %v187_v22  ;;  %v1831_v20 = vsel %vm97_vm0, %v181_v2, %v183_v37  ;;  %v1835_v39 = vsel %vm97_vm0, %v179_v24, %v181_v2 }
  0xbb   :  { %2678 = vst [vmem:[#allocation93_spill] sm:$0xff] %v1815_v34  ;;  %2679 = vst [vmem:[#allocation94_spill] sm:$0xff] %v1831_v20  ;;  %v203_v26 = vmul.f32 %v1455_v40, %v189_v35  ;;  %v301_v21 = vmul.f32 %v1458_v41, %v189_v35  ;;  %v395_v51 = vmul.f32 %v1461_v42, %v189_v35 }
  0xbc   :  { %v489_v14 = vmul.f32 %v1469_v43, %v189_v35  ;;  %v583_v23 = vmul.f32 %v1472_v44, %v189_v35  ;;  %v677_v15 = vmul.f32 %v1475_v45, %v189_v35  ;;  %v771_v22 = vmul.f32 %v1478_v46, %v189_v35 }
  0xbd   :  { %v865_v37 = vmul.f32 %v1488_v50, %v189_v35  ;;  %v213_v52 = vadd.f32 %v209_v5, %v203_v26  ;;  %v311_v18 = vadd.f32 %v307_v47, %v301_v21  ;;  %v405_v2 = vadd.f32 %v401_v57, %v395_v51  ;;  %v1164_v34 = vpop.eup %1163 }
  0xbe   :  { %v499_v24 = vadd.f32 %v495_v48, %v489_v14  ;;  %v593_v49 = vadd.f32 %v589_v58, %v583_v23  ;;  %v687_v31 = vadd.f32 %v683_v30, %v677_v15  ;;  %v781_v13 = vadd.f32 %v777_v32, %v771_v22 }
  0xbf   :  { %v875_v19 = vadd.f32 %v871_v33, %v865_v37  ;;  %v137_v54 = vmul.f32 %v1164_v34, %v1747_v29  ;;  %v202_v16 = vmul.f32 %v1455_v40, %v1827_v36  ;;  %v300_v20 = vmul.f32 %v1458_v41, %v1827_v36 }
  0xc0   :  { %v394_v51 = vmul.f32 %v1461_v42, %v1827_v36  ;;  %v488_v57 = vmul.f32 %v1469_v43, %v1827_v36  ;;  %v582_v5 = vmul.f32 %v1472_v44, %v1827_v36  ;;  %v676_v47 = vmul.f32 %v1475_v45, %v1827_v36 }
  0xc1   :  { %v770_v48 = vmul.f32 %v1478_v46, %v1827_v36  ;;  %v139_v58 = vsel %vm138_vm6, %v1747_v29, %v137_v54  ;;  %v212_v30 = vadd.f32 %v1715_v55, %v202_v16  ;;  %v310_v32 = vadd.f32 %v1718_v59, %v300_v20 }
  0xc2   :  { %v404_v33 = vadd.f32 %v1721_v28, %v394_v51  ;;  %v142_v34 = vsel %vm140_vm7, %v141_v56, %v139_v58  ;;  %v498_v35 = vadd.f32 %v1724_v60, %v488_v57  ;;  %v592_v26 = vadd.f32 %v1728_v25, %v582_v5 }
  0xc3   :  { %v686_v21 = vadd.f32 %v1735_v38, %v676_v47  ;;  %v2687_v14 = vstv %s2680_s24  ;;  %v2688_v15 = vstv %s2681_s26  ;;  %v2689_v16 = vstv %s2682_s28 }
  0xc4   :  { %v1873_v23 = vmul.f32 %v2687_v14, %v142_v34  ;;  %v1877_v54 = vmul.f32 %v2688_v15, %v142_v34  ;;  %v1881_v55 = vmul.f32 %v2689_v16, %v142_v34  ;;  %v2690_v59 = vstv %s2683_s29 }
  0xc5   :  { %v1885_v28 = vmul.f32 %v2690_v59, %v142_v34  ;;  %v2691_v29 = vstv %s2684_s10  ;;  %v2692_v60 = vstv %s2685_s11  ;;  %v2693_v25 = vstv %s2686_s12 }
  0xc6   :  { %v1889_v56 = vmul.f32 %v2691_v29, %v142_v34  ;;  %v1893_v20 = vmul.f32 %v2692_v60, %v142_v34  ;;  %v1897_v38 = vmul.f32 %v2693_v25, %v142_v34  ;;  %v2694_v22 = vstv %s2604_s18  ;;  %s2432_s18 = sld [smem:[#allocation2 + $0x48]] }
  0xc7   :  { %v1901_v37 = vmul.f32 %v2694_v22, %v142_v34  ;;  %v227_v51 = vrot.slane %v1873_v23, %v1293_v9  ;;  %v325_v57 = vrot.slane %v1877_v54, %v1293_v9  ;;  %v419_v5 = vrot.slane %v1881_v55, %v1293_v9 }
  0xc8   :  { %v513_v47 = vrot.slane %v1885_v28, %v1293_v9  ;;  %v607_v58 = vrot.slane %v1889_v56, %v1293_v9  ;;  %v701_v14 = vrot.slane %v1893_v20, %v1293_v9  ;;  %v795_v34 = vrot.slane %v1897_v38, %v1293_v9 }
  0xc9   :  { %v889_v15 = vrot.slane %v1901_v37, %v1293_v9  ;;  %v241_v16 = vadd.f32 %v227_v51, %v213_v52  ;;  %v339_v59 = vadd.f32 %v325_v57, %v311_v18  ;;  %v433_v29 = vadd.f32 %v419_v5, %v405_v2 }
  0xca   :  { %v527_v60 = vadd.f32 %v513_v47, %v499_v24  ;;  %v621_v25 = vadd.f32 %v607_v58, %v593_v49  ;;  %v715_v22 = vadd.f32 %v701_v14, %v687_v31  ;;  %v809_v46 = vadd.f32 %v795_v34, %v781_v13 }
  0xcb   :  { %v1919_v45 = vadd.f32 %v889_v15, %v875_v19  ;;  %v247_v44 = vadd.f32 %v1519_v61, %v241_v16  ;;  %v345_v43 = vadd.f32 %v1525_v63, %v339_v59  ;;  %v439_v42 = vadd.f32 %v1534_v3, %v433_v29 }
  0xcc   :  { %v533_v41 = vadd.f32 %v1537_v4, %v527_v60  ;;  %v627_v40 = vadd.f32 %v1540_v10, %v621_v25  ;;  %v721_v9 = vadd.f32 %v1545_v11, %v715_v22  ;;  %v815_v52 = vadd.f32 %v1548_v12, %v809_v46 }
  0xcd   :  { %2695 = vst [vmem:[#allocation95_spill] sm:$0xff] %v1919_v45  ;;  %v223_v49 = vrot.slane %v1873_v23, %v1287_v7  ;;  %v1930_v13 = vmax.f32 %v247_v44, 0.0  ;;  %v1932_v19 = vmax.f32 %v345_v43, 0.0  ;;  %v1934_v31 = vmax.f32 %v439_v42, 0.0  ;;  %v2715_v45 = vld [vmem:[#allocation78_spill] sm:$0xff] }
  0xce   :  { %v1936_v18 = vmax.f32 %v533_v41, 0.0  ;;  %v1938_v2 = vmax.f32 %v627_v40, 0.0  ;;  %v1940_v24 = vmax.f32 %v721_v9, 0.0  ;;  %v1942_v51 = vmax.f32 %v815_v52, 0.0 }
  0xcf   :  { %v240_v57 = vadd.f32 %v223_v49, %v212_v30  ;;  %v1946_v46 = vmul.f32 %v1522_v62, %v1930_v13  ;;  %v1950_v44 = vmul.f32 %v1531_v1, %v1930_v13  ;;  %v321_v42 = vrot.slane %v1877_v54, %v1287_v7 }
  0xd0   :  { %2696 = vst [vmem:[#allocation96_spill] sm:$0xff] %v1936_v18  ;;  %2697 = vst [vmem:[#allocation97_spill] sm:$0xff] %v1938_v2  ;;  %v415_v40 = vrot.slane %v1881_v55, %v1287_v7  ;;  %v509_v43 = vrot.slane %v1885_v28, %v1287_v7  ;;  %v603_v30 = vrot.slane %v1889_v56, %v1287_v7  ;;  %v2719_v18 = vld [vmem:[#allocation81_spill] sm:$0xff] }
  0xd1   :  { %2698 = vst [vmem:[#allocation98_spill] sm:$0xff] %v1940_v24  ;;  %2699 = vst [vmem:[#allocation99_spill] sm:$0xff] %v1942_v51  ;;  %v246_v41 = vadd.f32 %v1519_v61, %v240_v57  ;;  %v697_v5 = vrot.slane %v1893_v20, %v1287_v7  ;;  %v338_v47 = vadd.f32 %v321_v42, %v310_v32  ;;  %v2716_v51 = vld [vmem:[#allocation79_spill] sm:$0xff]  ;;  %v2717_v24 = vld [vmem:[#allocation80_spill] sm:$0xff] }
  0xd2   :  { %v432_v58 = vadd.f32 %v415_v40, %v404_v33  ;;  %v780_v14 = vadd.f32 %v1738_v0, %v770_v48  ;;  %v791_v34 = vrot.slane %v1897_v38, %v1287_v7  ;;  %v526_v16 = vadd.f32 %v509_v43, %v498_v35 }
  0xd3   :  { %v1966_v15 = vmax.f32 %v246_v41, 0.0  ;;  %v620_v59 = vadd.f32 %v603_v30, %v592_v26  ;;  %v714_v29 = vadd.f32 %v697_v5, %v686_v21  ;;  %v344_v60 = vadd.f32 %v1525_v63, %v338_v47 }
  0xd4   :  { %v438_v25 = vadd.f32 %v1534_v3, %v432_v58  ;;  %v808_v22 = vadd.f32 %v791_v34, %v780_v14  ;;  %v864_v9 = vmul.f32 %v1488_v50, %v1827_v36  ;;  %v532_v48 = vadd.f32 %v1537_v4, %v526_v16  ;;  %v2713_v34 = vld [vmem:[#allocation87_spill] sm:$0xff] }
  0xd5   :  { %v1974_v32 = vmul.f32 %v1522_v62, %v1966_v15  ;;  %v1978_v0 = vmul.f32 %v1531_v1, %v1966_v15  ;;  %v626_v33 = vadd.f32 %v1540_v10, %v620_v59  ;;  %v1982_v35 = vmax.f32 %v344_v60, 0.0 }
  0xd6   :  { %v1984_v26 = vmax.f32 %v438_v25, 0.0  ;;  %v720_v21 = vadd.f32 %v1545_v11, %v714_v29  ;;  %v814_v36 = vadd.f32 %v1548_v12, %v808_v22  ;;  %v1988_v52 = vmax.f32 %v532_v48, 0.0  ;;  %v2705_v22 = vld [vmem:[#allocation94_spill] sm:$0xff]  ;;  %v2714_v48 = vld [vmem:[#allocation88_spill] sm:$0xff] }
  0xd7   :  { %v1990_v49 = vmax.f32 %v626_v33, 0.0  ;;  %v874_v57 = vadd.f32 %v1741_v27, %v864_v9  ;;  %v885_v42 = vrot.slane %v1901_v37, %v1287_v7  ;;  %v231_v43 = vrot.slane %v1873_v23, %v1284_v6  ;;  %v2706_v9 = vld [vmem:[#allocation11_spill] sm:$0xff] }
  0xd8   :  { %2700 = vst [vmem:[#allocation100_spill] sm:$0xff] %v1988_v52  ;;  %v1995_v40 = vmax.f32 %v720_v21, 0.0  ;;  %v1997_v41 = vmax.f32 %v814_v36, 0.0  ;;  %v235_v30 = vrot.slane %v1873_v23, %v1290_v8  ;;  %v329_v47 = vrot.slane %v1877_v54, %v1284_v6  ;;  %v2708_v21 = vld [vmem:[#allocation32_spill] sm:$0xff]  ;;  %v2710_v29 = vld [vmem:[#allocation34_spill] sm:$0xff] }
  0xd9   :  { %2701 = vst [vmem:[#allocation101_spill] sm:$0xff] %v1990_v49  ;;  %v2003_v5 = vadd.f32 %v885_v42, %v874_v57  ;;  %v333_v27 = vrot.slane %v1877_v54, %v1290_v8  ;;  %v423_v7 = vrot.slane %v1881_v55, %v1284_v6  ;;  %v427_v58 = vrot.slane %v1881_v55, %v1290_v8  ;;  %v2709_v57 = vld [vmem:[#allocation33_spill] sm:$0xff]  ;;  %v2711_v54 = vld [vmem:[#allocation35_spill] sm:$0xff] }
  0xda   :  { %2702 = vst [vmem:[#allocation102_spill] sm:$0xff] %v1995_v40  ;;  %2703 = vst [vmem:[#allocation103_spill] sm:$0xff] %v1997_v41  ;;  %v517_v14 = vrot.slane %v1885_v28, %v1284_v6  ;;  %v521_v23 = vrot.slane %v1885_v28, %v1290_v8  ;;  %v190_v25 = vsel %vm1502_vm4, %v1315_v17, %v1835_v39  ;;  %v2712_v17 = vld [vmem:[#allocation86_spill] sm:$0xff]  ;;  %v2718_v40 = vld [vmem:[#allocation89_spill] sm:$0xff] }
  0xdb   :  { %2704 = vst [vmem:[#allocation104_spill] sm:$0xff] %v2003_v5  ;;  %v191_v33 = vsel %vm1506_vm5, %v2706_v9, %v2705_v22  ;;  %v204_v36 = vmul.f32 %v2708_v21, %v190_v25  ;;  %v302_v42 = vmul.f32 %v2709_v57, %v190_v25  ;;  %v396_v55 = vmul.f32 %v2710_v29, %v190_v25 }
  0xdc   :  { %v205_v28 = vmul.f32 %v2708_v21, %v191_v33  ;;  %v303_v60 = vmul.f32 %v2709_v57, %v191_v33  ;;  %v397_v59 = vmul.f32 %v2710_v29, %v191_v33  ;;  %v490_v16 = vmul.f32 %v2711_v54, %v190_v25 }
  0xdd   :  { %v214_v39 = vadd.f32 %v2712_v17, %v204_v36  ;;  %v312_v53 = vadd.f32 %v2713_v34, %v302_v42  ;;  %v406_v22 = vadd.f32 %v2714_v48, %v396_v55  ;;  %v491_v9 = vmul.f32 %v2711_v54, %v191_v33  ;;  %v2723_v48 = vld [vmem:[#allocation38_spill] sm:$0xff] }
  0xde   :  { %v215_v5 = vadd.f32 %v2715_v45, %v205_v28  ;;  %v313_v41 = vadd.f32 %v2716_v51, %v303_v60  ;;  %v407_v21 = vadd.f32 %v2717_v24, %v397_v59  ;;  %v500_v57 = vadd.f32 %v2718_v40, %v490_v16  ;;  %v2722_v59 = vld [vmem:[#allocation90_spill] sm:$0xff] }
  0xdf   :  { %v242_v2 = vadd.f32 %v231_v43, %v214_v39  ;;  %v340_v29 = vadd.f32 %v329_v47, %v312_v53  ;;  %v434_v49 = vadd.f32 %v423_v7, %v406_v22  ;;  %v501_v52 = vadd.f32 %v2719_v18, %v491_v9  ;;  %v2724_v9 = vld [vmem:[#allocation82_spill] sm:$0xff] }
  0xe0   :  { %v243_v36 = vadd.f32 %v235_v30, %v215_v5  ;;  %v341_v17 = vadd.f32 %v333_v27, %v313_v41  ;;  %v435_v34 = vadd.f32 %v427_v58, %v407_v21  ;;  %v528_v42 = vadd.f32 %v517_v14, %v500_v57  ;;  %v2720_v27 = vld [vmem:[#allocation36_spill] sm:$0xff]  ;;  %v2725_v57 = vld [vmem:[#allocation91_spill] sm:$0xff] }
  0xe1   :  { %v248_v55 = vadd.f32 %v1519_v61, %v242_v2  ;;  %v346_v54 = vadd.f32 %v1525_v63, %v340_v29  ;;  %v440_v45 = vadd.f32 %v1534_v3, %v434_v49  ;;  %v529_v51 = vadd.f32 %v521_v23, %v501_v52  ;;  %v2721_v23 = vld [vmem:[#allocation37_spill] sm:$0xff] }
  0xe2   :  { %v249_v24 = vadd.f32 %v1519_v61, %v243_v36  ;;  %v347_v40 = vadd.f32 %v1525_v63, %v341_v17  ;;  %v441_v53 = vadd.f32 %v1534_v3, %v435_v34  ;;  %v534_v43 = vadd.f32 %v1537_v4, %v528_v42  ;;  %v2727_v34 = vld [vmem:[#allocation83_spill] sm:$0xff] }
  0xe3   :  { %v2064_v18 = vmax.f32 %v248_v55, 0.0  ;;  %v2066_v41 = vmax.f32 %v346_v54, 0.0  ;;  %v2068_v30 = vmax.f32 %v440_v45, 0.0  ;;  %v535_v2 = vadd.f32 %v1537_v4, %v529_v51  ;;  %v2728_v55 = vld [vmem:[#allocation92_spill] sm:$0xff] }
  0xe4   :  { %v2071_v5 = vmax.f32 %v249_v24, 0.0  ;;  %v2073_v49 = vmax.f32 %v347_v40, 0.0  ;;  %v2075_v52 = vmax.f32 %v441_v53, 0.0  ;;  %v2077_v61 = vmax.f32 %v534_v43, 0.0  ;;  %v2729_v45 = vld [vmem:[#allocation84_spill] sm:$0xff]  ;;  %v2732_v43 = vld [vmem:[#allocation93_spill] sm:$0xff] }
  0xe5   :  { %v258_v63 = vmul.f32 %v1522_v62, %v2064_v18  ;;  %v269_v3 = vmul.f32 %v1531_v1, %v2064_v18  ;;  %v2083_v47 = vmax.f32 %v535_v2, 0.0  ;;  %v584_v7 = vmul.f32 %v2720_v27, %v190_v25 }
  0xe6   :  { %v259_v4 = vmul.f32 %v1522_v62, %v2071_v5  ;;  %v270_v58 = vmul.f32 %v1531_v1, %v2071_v5  ;;  %v585_v14 = vmul.f32 %v2720_v27, %v191_v33  ;;  %v678_v16 = vmul.f32 %v2721_v23, %v190_v25 }
  0xe7   :  { %v594_v28 = vadd.f32 %v2722_v59, %v584_v7  ;;  %v679_v60 = vmul.f32 %v2721_v23, %v191_v33  ;;  %v772_v39 = vmul.f32 %v2723_v48, %v190_v25  ;;  %v773_v22 = vmul.f32 %v2723_v48, %v191_v33 }
  0xe8   :  { %v595_v21 = vadd.f32 %v2724_v9, %v585_v14  ;;  %v688_v29 = vadd.f32 %v2725_v57, %v678_v16  ;;  %v866_v62 = vmul.f32 %v1488_v50, %v190_v25  ;;  %v867_v1 = vmul.f32 %v1488_v50, %v191_v33  ;;  %v2733_v33 = vld [vmem:[#allocation85_spill] sm:$0xff] }
  0xe9   :  { %v2726_v36 = vrot.slane %v1889_v56, %v1284_v6  ;;  %v689_v42 = vadd.f32 %v2727_v34, %v679_v60  ;;  %v782_v54 = vadd.f32 %v2728_v55, %v772_v39  ;;  %v783_v51 = vadd.f32 %v2729_v45, %v773_v22  ;;  %v2741_v55 = vld [vmem:[#allocation45_spill] sm:$0xff] }
  0xea   :  { %v2730_v24 = vrot.slane %v1889_v56, %v1290_v8  ;;  %v2731_v53 = vrot.slane %v1893_v20, %v1284_v6  ;;  %v876_v50 = vadd.f32 %v2732_v43, %v866_v62  ;;  %v877_v2 = vadd.f32 %v2733_v33, %v867_v1 }
  0xeb   :  { %v622_v17 = vadd.f32 %v2726_v36, %v594_v28  ;;  %v2734_v7 = vrot.slane %v1893_v20, %v1290_v8  ;;  %v2735_v23 = vrot.slane %v1897_v38, %v1284_v6  ;;  %v2736_v56 = vrot.slane %v1897_v38, %v1290_v8 }
  0xec   :  { %v623_v40 = vadd.f32 %v2730_v24, %v595_v21  ;;  %v716_v25 = vadd.f32 %v2731_v53, %v688_v29  ;;  %v2737_v48 = vrot.slane %v1901_v37, %v1284_v6  ;;  %v2738_v20 = vrot.slane %v1901_v37, %v1290_v8  ;;  %v2739_v6 = vld [vmem:[#allocation43_spill] sm:$0xff] }
  0xed   :  { %v628_v27 = vadd.f32 %v1540_v10, %v622_v17  ;;  %v717_v14 = vadd.f32 %v2734_v7, %v689_v42  ;;  %v810_v16 = vadd.f32 %v2735_v23, %v782_v54  ;;  %v811_v59 = vadd.f32 %v2736_v56, %v783_v51  ;;  %v2740_v17 = vld [vmem:[#allocation44_spill] sm:$0xff]  ;;  %v2746_v23 = vld [vmem:[#allocation50_spill] sm:$0xff] }
  0xee   :  { %v629_v28 = vadd.f32 %v1540_v10, %v623_v40  ;;  %v722_v60 = vadd.f32 %v1545_v11, %v716_v25  ;;  %v2129_v39 = vadd.f32 %v2737_v48, %v876_v50  ;;  %v2134_v22 = vadd.f32 %v2738_v20, %v877_v2  ;;  %v2744_v50 = vld [vmem:[#allocation48_spill] sm:$0xff] }
  0xef   :  { %v2136_v9 = vmax.f32 %v628_v27, 0.0  ;;  %v723_v21 = vadd.f32 %v1545_v11, %v717_v14  ;;  %v816_v38 = vadd.f32 %v1548_v12, %v810_v16  ;;  %v817_v10 = vadd.f32 %v1548_v12, %v811_v59 }
  0xf0   :  { %v2141_v57 = vmax.f32 %v629_v28, 0.0  ;;  %v2143_v29 = vmax.f32 %v722_v60, 0.0  ;;  %v261_v62 = vadd.f32 %v2739_v6, %v1974_v32  ;;  %v262_v8 = vadd.f32 %v2739_v6, %v1946_v46 }
  0xf1   :  { %v2149_v37 = vmax.f32 %v723_v21, 0.0  ;;  %v2151_v1 = vmax.f32 %v816_v38, 0.0  ;;  %v2153_v36 = vmax.f32 %v817_v10, 0.0  ;;  %v263_v11 = vadd.f32 %v2739_v6, %v258_v63 }
  0xf2   :  { %v264_v12 = vadd.f32 %v2739_v6, %v259_v4  ;;  %v272_v34 = vadd.f32 %v2740_v17, %v1978_v0  ;;  %v273_v42 = vadd.f32 %v2740_v17, %v1950_v44  ;;  %v274_v32 = vadd.f32 %v2740_v17, %v269_v3  ;;  %v2742_v0 = vld [vmem:[#allocation47_spill] sm:$0xff] }
  0xf3   :  { %v275_v46 = vadd.f32 %v2740_v17, %v270_v58  ;;  %v278_v54 = vmul.f32 %v2741_v55, %v1966_v15  ;;  %v279_v45 = vmul.f32 %v2741_v55, %v1930_v13  ;;  %v280_v63 = vmul.f32 %v2741_v55, %v2064_v18  ;;  %v2743_v58 = vld [vmem:[#allocation46_spill] sm:$0xff] }
  0xf4   :  { %v281_v4 = vmul.f32 %v2741_v55, %v2071_v5  ;;  %v289_v51 = vmul.f32 %v2742_v0, %v1966_v15  ;;  %v290_v44 = vmul.f32 %v2742_v0, %v1930_v13  ;;  %v291_v3 = vmul.f32 %v2742_v0, %v2064_v18  ;;  %v2745_v18 = vld [vmem:[#allocation49_spill] sm:$0xff]  ;;  %v2747_v55 = vld [vmem:[#allocation51_spill] sm:$0xff] }
  0xf5   :  { %v283_v24 = vadd.f32 %v2743_v58, %v278_v54  ;;  %v284_v40 = vadd.f32 %v2743_v58, %v279_v45  ;;  %v285_v53 = vadd.f32 %v2743_v58, %v280_v63  ;;  %v292_v25 = vmul.f32 %v2742_v0, %v2071_v5 }
  0xf6   :  { %v286_v43 = vadd.f32 %v2743_v58, %v281_v4  ;;  %v294_v33 = vadd.f32 %v2744_v50, %v289_v51  ;;  %v295_v15 = vadd.f32 %v2744_v50, %v290_v44  ;;  %v296_v13 = vadd.f32 %v2744_v50, %v291_v3 }
  0xf7   :  { %v297_v2 = vadd.f32 %v2744_v50, %v292_v25  ;;  %v354_v27 = vmul.f32 %v2745_v18, %v1982_v35  ;;  %v355_v7 = vmul.f32 %v2745_v18, %v1932_v19  ;;  %v356_v14 = vmul.f32 %v2745_v18, %v2066_v41  ;;  %v2749_v25 = vld [vmem:[#allocation53_spill] sm:$0xff] }
  0xf8   :  { %v357_v5 = vmul.f32 %v2745_v18, %v2073_v49  ;;  %v364_v16 = vmul.f32 %v2746_v23, %v1982_v35  ;;  %v365_v56 = vmul.f32 %v2746_v23, %v1932_v19  ;;  %v366_v59 = vmul.f32 %v2746_v23, %v2066_v41 }
  0xf9   :  { %v358_v28 = vadd.f32 %v354_v27, %v261_v62  ;;  %v359_v60 = vadd.f32 %v355_v7, %v262_v8  ;;  %v360_v48 = vadd.f32 %v356_v14, %v263_v11  ;;  %v367_v20 = vmul.f32 %v2746_v23, %v2073_v49  ;;  %v2748_v8 = vld [vmem:[#allocation52_spill] sm:$0xff] }
  0xfa   :  { %v361_v21 = vadd.f32 %v357_v5, %v264_v12  ;;  %v368_v38 = vadd.f32 %v364_v16, %v272_v34  ;;  %v369_v10 = vadd.f32 %v365_v56, %v273_v42  ;;  %v370_v6 = vadd.f32 %v366_v59, %v274_v32  ;;  %v2751_v5 = vld [vmem:[#allocation55_spill] sm:$0xff] }
  0xfb   :  { %v371_v17 = vadd.f32 %v367_v20, %v275_v46  ;;  %v374_v54 = vmul.f32 %v2747_v55, %v1982_v35  ;;  %v375_v45 = vmul.f32 %v2747_v55, %v1932_v19  ;;  %v376_v63 = vmul.f32 %v2747_v55, %v2066_v41 }
  0xfc   :  { %v377_v62 = vmul.f32 %v2747_v55, %v2073_v49  ;;  %v384_v11 = vmul.f32 %v2748_v8, %v1982_v35  ;;  %v385_v12 = vmul.f32 %v2748_v8, %v1932_v19  ;;  %v386_v34 = vmul.f32 %v2748_v8, %v2066_v41 }
  0xfd   :  { %v378_v42 = vadd.f32 %v374_v54, %v283_v24  ;;  %v379_v32 = vadd.f32 %v375_v45, %v284_v40  ;;  %v380_v46 = vadd.f32 %v376_v63, %v285_v53  ;;  %v387_v4 = vmul.f32 %v2748_v8, %v2073_v49  ;;  %v2750_v40 = vld [vmem:[#allocation54_spill] sm:$0xff]  ;;  %v2754_v8 = vld [vmem:[#allocation57_spill] sm:$0xff] }
  0xfe   :  { %v381_v0 = vadd.f32 %v377_v62, %v286_v43  ;;  %v388_v51 = vadd.f32 %v384_v11, %v294_v33  ;;  %v389_v44 = vadd.f32 %v385_v12, %v295_v15  ;;  %v390_v3 = vadd.f32 %v386_v34, %v296_v13  ;;  %v2753_v62 = vld [vmem:[#allocation100_spill] sm:$0xff]  ;;  %v2756_v34 = vld [vmem:[#allocation58_spill] sm:$0xff] }
  0xff   :  { %v391_v58 = vadd.f32 %v387_v4, %v297_v2  ;;  %v448_v35 = vmul.f32 %v2749_v25, %v1984_v26  ;;  %v449_v19 = vmul.f32 %v2749_v25, %v1934_v31  ;;  %v450_v41 = vmul.f32 %v2749_v25, %v2068_v30  ;;  %v2755_v11 = vld [vmem:[#allocation96_spill] sm:$0xff] }
 0x100   :  { %v451_v24 = vmul.f32 %v2749_v25, %v2075_v52  ;;  %v458_v49 = vmul.f32 %v2750_v40, %v1984_v26  ;;  %v459_v53 = vmul.f32 %v2750_v40, %v1934_v31  ;;  %v460_v43 = vmul.f32 %v2750_v40, %v2068_v30 }
 0x101   :  { %v452_v50 = vadd.f32 %v448_v35, %v358_v28  ;;  %v453_v33 = vadd.f32 %v449_v19, %v359_v60  ;;  %v454_v15 = vadd.f32 %v450_v41, %v360_v48  ;;  %v461_v13 = vmul.f32 %v2750_v40, %v2075_v52  ;;  %v2752_v28 = vld [vmem:[#allocation56_spill] sm:$0xff]  ;;  %v2757_v19 = vld [vmem:[#allocation59_spill] sm:$0xff] }
 0x102   :  { %v455_v2 = vadd.f32 %v451_v24, %v361_v21  ;;  %v462_v18 = vadd.f32 %v458_v49, %v368_v38  ;;  %v463_v27 = vadd.f32 %v459_v53, %v369_v10  ;;  %v464_v7 = vadd.f32 %v460_v43, %v370_v6  ;;  %v2758_v53 = vld [vmem:[#allocation60_spill] sm:$0xff] }
 0x103   :  { %v465_v14 = vadd.f32 %v461_v13, %v371_v17  ;;  %v468_v23 = vmul.f32 %v2751_v5, %v1984_v26  ;;  %v469_v16 = vmul.f32 %v2751_v5, %v1934_v31  ;;  %v470_v56 = vmul.f32 %v2751_v5, %v2068_v30 }
 0x104   :  { %v471_v59 = vmul.f32 %v2751_v5, %v2075_v52  ;;  %v478_v60 = vmul.f32 %v2752_v28, %v1984_v26  ;;  %v479_v48 = vmul.f32 %v2752_v28, %v1934_v31  ;;  %v480_v20 = vmul.f32 %v2752_v28, %v2068_v30 }
 0x105   :  { %v472_v21 = vadd.f32 %v468_v23, %v378_v42  ;;  %v473_v38 = vadd.f32 %v469_v16, %v379_v32  ;;  %v474_v10 = vadd.f32 %v470_v56, %v380_v46  ;;  %v481_v6 = vmul.f32 %v2752_v28, %v2075_v52  ;;  %v2759_v16 = vld [vmem:[#allocation101_spill] sm:$0xff] }
 0x106   :  { %v475_v17 = vadd.f32 %v471_v59, %v381_v0  ;;  %v482_v55 = vadd.f32 %v478_v60, %v388_v51  ;;  %v483_v54 = vadd.f32 %v479_v48, %v389_v44  ;;  %v484_v45 = vadd.f32 %v480_v20, %v390_v3  ;;  %v2760_v56 = vld [vmem:[#allocation61_spill] sm:$0xff]  ;;  %v2762_v20 = vld [vmem:[#allocation62_spill] sm:$0xff] }
 0x107   :  { %v485_v63 = vadd.f32 %v481_v6, %v391_v58  ;;  %v542_v26 = vmul.f32 %v2754_v8, %v2753_v62  ;;  %v543_v31 = vmul.f32 %v2754_v8, %v2755_v11  ;;  %v544_v30 = vmul.f32 %v2754_v8, %v2077_v61  ;;  %v2761_v28 = vld [vmem:[#allocation97_spill] sm:$0xff] }
 0x108   :  { %v545_v12 = vmul.f32 %v2754_v8, %v2083_v47  ;;  %v552_v52 = vmul.f32 %v2756_v34, %v2753_v62  ;;  %v553_v42 = vmul.f32 %v2756_v34, %v2755_v11  ;;  %v554_v32 = vmul.f32 %v2756_v34, %v2077_v61 }
 0x109   :  { %v546_v46 = vadd.f32 %v542_v26, %v452_v50  ;;  %v547_v4 = vadd.f32 %v543_v31, %v453_v33  ;;  %v548_v0 = vadd.f32 %v544_v30, %v454_v15  ;;  %v555_v51 = vmul.f32 %v2756_v34, %v2083_v47  ;;  %v2763_v26 = vld [vmem:[#allocation63_spill] sm:$0xff]  ;;  %v2764_v34 = vld [vmem:[#allocation64_spill] sm:$0xff] }
 0x10a   :  { %v549_v44 = vadd.f32 %v545_v12, %v455_v2  ;;  %v556_v3 = vadd.f32 %v552_v52, %v462_v18  ;;  %v557_v58 = vadd.f32 %v553_v42, %v463_v27  ;;  %v558_v25 = vadd.f32 %v554_v32, %v464_v7 }
 0x10b   :  { %v559_v35 = vadd.f32 %v555_v51, %v465_v14  ;;  %v562_v41 = vmul.f32 %v2757_v19, %v2753_v62  ;;  %v563_v24 = vmul.f32 %v2757_v19, %v2755_v11  ;;  %v564_v40 = vmul.f32 %v2757_v19, %v2077_v61 }
 0x10c   :  { %v565_v49 = vmul.f32 %v2757_v19, %v2083_v47  ;;  %v572_v43 = vmul.f32 %v2758_v53, %v2753_v62  ;;  %v573_v50 = vmul.f32 %v2758_v53, %v2755_v11  ;;  %v574_v33 = vmul.f32 %v2758_v53, %v2077_v61  ;;  %v2765_v19 = vld [vmem:[#allocation102_spill] sm:$0xff] }
 0x10d   :  { %v566_v15 = vadd.f32 %v562_v41, %v472_v21  ;;  %v567_v13 = vadd.f32 %v563_v24, %v473_v38  ;;  %v568_v2 = vadd.f32 %v564_v40, %v474_v10  ;;  %v575_v18 = vmul.f32 %v2758_v53, %v2083_v47  ;;  %v2766_v41 = vld [vmem:[#allocation65_spill] sm:$0xff]  ;;  %v2767_v40 = vld [vmem:[#allocation98_spill] sm:$0xff] }
 0x10e   :  { %v569_v27 = vadd.f32 %v565_v49, %v475_v17  ;;  %v576_v7 = vadd.f32 %v572_v43, %v482_v55  ;;  %v577_v14 = vadd.f32 %v573_v50, %v483_v54  ;;  %v578_v5 = vadd.f32 %v574_v33, %v484_v45  ;;  %v2768_v43 = vld [vmem:[#allocation66_spill] sm:$0xff] }
 0x10f   :  { %v579_v23 = vadd.f32 %v575_v18, %v485_v63  ;;  %v636_v59 = vmul.f32 %v2760_v56, %v2759_v16  ;;  %v637_v60 = vmul.f32 %v2760_v56, %v2761_v28  ;;  %v638_v61 = vmul.f32 %v2760_v56, %v2136_v9 }
 0x110   :  { %v639_v48 = vmul.f32 %v2760_v56, %v2141_v57  ;;  %v646_v47 = vmul.f32 %v2762_v20, %v2759_v16  ;;  %v647_v21 = vmul.f32 %v2762_v20, %v2761_v28  ;;  %v648_v38 = vmul.f32 %v2762_v20, %v2136_v9 }
 0x111   :  { %v640_v10 = vadd.f32 %v636_v59, %v546_v46  ;;  %v641_v6 = vadd.f32 %v637_v60, %v547_v4  ;;  %v642_v17 = vadd.f32 %v638_v61, %v548_v0  ;;  %v649_v55 = vmul.f32 %v2762_v20, %v2141_v57  ;;  %v2770_v61 = vld [vmem:[#allocation68_spill] sm:$0xff] }
 0x112   :  { %v643_v54 = vadd.f32 %v639_v48, %v549_v44  ;;  %v650_v45 = vadd.f32 %v646_v47, %v556_v3  ;;  %v651_v63 = vadd.f32 %v647_v21, %v557_v58  ;;  %v652_v62 = vadd.f32 %v648_v38, %v558_v25 }
 0x113   :  { %v653_v8 = vadd.f32 %v649_v55, %v559_v35  ;;  %v656_v11 = vmul.f32 %v2763_v26, %v2759_v16  ;;  %v657_v31 = vmul.f32 %v2763_v26, %v2761_v28  ;;  %v658_v30 = vmul.f32 %v2763_v26, %v2136_v9 }
 0x114   :  { %v659_v12 = vmul.f32 %v2763_v26, %v2141_v57  ;;  %v666_v52 = vmul.f32 %v2764_v34, %v2759_v16  ;;  %v667_v42 = vmul.f32 %v2764_v34, %v2761_v28  ;;  %v668_v32 = vmul.f32 %v2764_v34, %v2136_v9  ;;  %v2769_v16 = vld [vmem:[#allocation67_spill] sm:$0xff] }
 0x115   :  { %v660_v46 = vadd.f32 %v656_v11, %v566_v15  ;;  %v661_v4 = vadd.f32 %v657_v31, %v567_v13  ;;  %v662_v0 = vadd.f32 %v658_v30, %v568_v2  ;;  %v669_v51 = vmul.f32 %v2764_v34, %v2141_v57  ;;  %v2773_v11 = vld [vmem:[#allocation99_spill] sm:$0xff] }
 0x116   :  { %v663_v44 = vadd.f32 %v659_v12, %v569_v27  ;;  %v670_v3 = vadd.f32 %v666_v52, %v576_v7  ;;  %v671_v58 = vadd.f32 %v667_v42, %v577_v14  ;;  %v672_v25 = vadd.f32 %v668_v32, %v578_v5 }
 0x117   :  { %v673_v35 = vadd.f32 %v669_v51, %v579_v23  ;;  %v730_v24 = vmul.f32 %v2766_v41, %v2765_v19  ;;  %v731_v49 = vmul.f32 %v2766_v41, %v2767_v40  ;;  %v732_v9 = vmul.f32 %v2766_v41, %v2143_v29 }
 0x118   :  { %v733_v53 = vmul.f32 %v2766_v41, %v2149_v37  ;;  %v740_v57 = vmul.f32 %v2768_v43, %v2765_v19  ;;  %v741_v50 = vmul.f32 %v2768_v43, %v2767_v40  ;;  %v742_v33 = vmul.f32 %v2768_v43, %v2143_v29 }
 0x119   :  { %v734_v15 = vadd.f32 %v730_v24, %v640_v10  ;;  %v735_v13 = vadd.f32 %v731_v49, %v641_v6  ;;  %v736_v2 = vadd.f32 %v732_v9, %v642_v17  ;;  %v743_v18 = vmul.f32 %v2768_v43, %v2149_v37 }
 0x11a   :  { %v737_v27 = vadd.f32 %v733_v53, %v643_v54  ;;  %v744_v7 = vadd.f32 %v740_v57, %v650_v45  ;;  %v745_v14 = vadd.f32 %v741_v50, %v651_v63  ;;  %v746_v5 = vadd.f32 %v742_v33, %v652_v62  ;;  %v2771_v62 = vld [vmem:[#allocation103_spill] sm:$0xff] }
 0x11b   :  { %v747_v23 = vadd.f32 %v743_v18, %v653_v8  ;;  %v750_v56 = vmul.f32 %v2769_v16, %v2765_v19  ;;  %v751_v59 = vmul.f32 %v2769_v16, %v2767_v40  ;;  %v752_v28 = vmul.f32 %v2769_v16, %v2143_v29  ;;  %v2772_v8 = vld [vmem:[#allocation69_spill] sm:$0xff] }
 0x11c   :  { %v753_v60 = vmul.f32 %v2769_v16, %v2149_v37  ;;  %v760_v48 = vmul.f32 %v2770_v61, %v2765_v19  ;;  %v761_v20 = vmul.f32 %v2770_v61, %v2767_v40  ;;  %v762_v47 = vmul.f32 %v2770_v61, %v2143_v29  ;;  %v2776_v40 = vld [vmem:[#allocation72_spill] sm:$0xff] }
 0x11d   :  { %v754_v21 = vadd.f32 %v750_v56, %v660_v46  ;;  %v755_v38 = vadd.f32 %v751_v59, %v661_v4  ;;  %v756_v10 = vadd.f32 %v752_v28, %v662_v0  ;;  %v763_v6 = vmul.f32 %v2770_v61, %v2149_v37  ;;  %v2774_v37 = vld [vmem:[#allocation70_spill] sm:$0xff] }
 0x11e   :  { %v757_v17 = vadd.f32 %v753_v60, %v663_v44  ;;  %v764_v55 = vadd.f32 %v760_v48, %v670_v3  ;;  %v765_v54 = vadd.f32 %v761_v20, %v671_v58  ;;  %v766_v45 = vadd.f32 %v762_v47, %v672_v25  ;;  %v2775_v25 = vld [vmem:[#allocation71_spill] sm:$0xff] }
 0x11f   :  { %v767_v63 = vadd.f32 %v763_v6, %v673_v35  ;;  %v824_v26 = vmul.f32 %v2772_v8, %v2771_v62  ;;  %v825_v31 = vmul.f32 %v2772_v8, %v2773_v11  ;;  %v826_v29 = vmul.f32 %v2772_v8, %v2151_v1 }
 0x120   :  { %v827_v30 = vmul.f32 %v2772_v8, %v2153_v36  ;;  %v834_v12 = vmul.f32 %v2774_v37, %v2771_v62  ;;  %v835_v34 = vmul.f32 %v2774_v37, %v2773_v11  ;;  %v836_v52 = vmul.f32 %v2774_v37, %v2151_v1 }
 0x121   :  { %v828_v42 = vadd.f32 %v824_v26, %v734_v15  ;;  %v829_v32 = vadd.f32 %v825_v31, %v735_v13  ;;  %v830_v46 = vadd.f32 %v826_v29, %v736_v2  ;;  %v837_v4 = vmul.f32 %v2774_v37, %v2153_v36 }
 0x122   :  { %v831_v0 = vadd.f32 %v827_v30, %v737_v27  ;;  %v838_v51 = vadd.f32 %v834_v12, %v744_v7  ;;  %v839_v44 = vadd.f32 %v835_v34, %v745_v14  ;;  %v840_v3 = vadd.f32 %v836_v52, %v746_v5  ;;  %v2777_v7 = vld [vmem:[#allocation104_spill] sm:$0xff]  ;;  %v2778_v14 = vld [vmem:[#allocation73_spill] sm:$0xff] }
 0x123   :  { %v841_v58 = vadd.f32 %v837_v4, %v747_v23  ;;  %v844_v35 = vmul.f32 %v2775_v25, %v2771_v62  ;;  %v845_v19 = vmul.f32 %v2775_v25, %v2773_v11  ;;  %v846_v41 = vmul.f32 %v2775_v25, %v2151_v1  ;;  %v2779_v23 = vld [vmem:[#allocation95_spill] sm:$0xff] }
 0x124   :  { %v847_v24 = vmul.f32 %v2775_v25, %v2153_v36  ;;  %v854_v49 = vmul.f32 %v2776_v40, %v2771_v62  ;;  %v855_v9 = vmul.f32 %v2776_v40, %v2773_v11  ;;  %v856_v53 = vmul.f32 %v2776_v40, %v2151_v1  ;;  %v2785_v62 = vld [vmem:[#allocation75_spill] sm:$0xff] }
 0x125   :  { %v848_v43 = vadd.f32 %v844_v35, %v754_v21  ;;  %v849_v57 = vadd.f32 %v845_v19, %v755_v38  ;;  %v850_v50 = vadd.f32 %v846_v41, %v756_v10  ;;  %v857_v33 = vmul.f32 %v2776_v40, %v2153_v36  ;;  %v2786_v19 = vld [vmem:[#allocation76_spill] sm:$0xff] }
 0x126   :  { %v851_v15 = vadd.f32 %v847_v24, %v757_v17  ;;  %v858_v13 = vadd.f32 %v854_v49, %v764_v55  ;;  %v859_v2 = vadd.f32 %v855_v9, %v765_v54  ;;  %v860_v18 = vadd.f32 %v856_v53, %v766_v45  ;;  %v2784_v55 = vld [vmem:[#allocation74_spill] sm:$0xff] }
 0x127   :  { %v861_v27 = vadd.f32 %v857_v33, %v767_v63  ;;  %v908_v5 = vadd.f32 %v2778_v14, %v2777_v7  ;;  %v909_v16 = vadd.f32 %v2778_v14, %v2779_v23  ;;  %v910_v1 = vadd.f32 %v2778_v14, %v2129_v39 }
 0x128   :  { %v911_v56 = vadd.f32 %v2778_v14, %v2134_v22  ;;  %v2394_v59 = vstv %s2353_s13  ;;  %v2397_v36 = vstv %s2363_s14  ;;  %v2400_v28 = vstv %s2365_s15 }
 0x129   :  { %v912_v60 = vmax.f32 %v908_v5, 0.0  ;;  %v913_v61 = vmax.f32 %v909_v16, 0.0  ;;  %v914_v48 = vmax.f32 %v910_v1, 0.0  ;;  %v976_v47 = vsel %vm1498_vm3, %v2394_v59, %v2397_v36 }
 0x12a   :  { %v915_v21 = vmax.f32 %v911_v56, 0.0  ;;  %v977_v22 = vsel %vm1494_vm2, %v2394_v59, %v2397_v36  ;;  %v978_v10 = vsel %vm1502_vm4, %v2394_v59, %v2397_v36  ;;  %v979_v17 = vsel %vm1506_vm5, %v2394_v59, %v2397_v36 }
 0x12b   :  { %v918_v54 = vmul.f32 %v2784_v55, %v912_v60  ;;  %v919_v45 = vmul.f32 %v2784_v55, %v913_v61  ;;  %v920_v63 = vmul.f32 %v2784_v55, %v914_v48  ;;  %v928_v8 = vmul.f32 %v2785_v62, %v912_v60 }
 0x12c   :  { %v921_v26 = vmul.f32 %v2784_v55, %v915_v21  ;;  %v929_v11 = vmul.f32 %v2785_v62, %v913_v61  ;;  %v930_v31 = vmul.f32 %v2785_v62, %v914_v48  ;;  %v931_v29 = vmul.f32 %v2785_v62, %v915_v21 }
 0x12d   :  { %v922_v30 = vadd.f32 %v918_v54, %v828_v42  ;;  %v923_v37 = vadd.f32 %v919_v45, %v829_v32  ;;  %v924_v12 = vadd.f32 %v920_v63, %v830_v46  ;;  %v932_v34 = vadd.f32 %v928_v8, %v838_v51  ;;  %v2787_v42 = vld [vmem:[#allocation77_spill] sm:$0xff] }
 0x12e   :  { %v925_v52 = vadd.f32 %v921_v26, %v831_v0  ;;  %v933_v4 = vadd.f32 %v929_v11, %v839_v44  ;;  %v934_v25 = vadd.f32 %v930_v31, %v840_v3  ;;  %v935_v35 = vadd.f32 %v931_v29, %v841_v58 }
 0x12f   :  { %v938_v41 = vmul.f32 %v2786_v19, %v912_v60  ;;  %v939_v24 = vmul.f32 %v2786_v19, %v913_v61  ;;  %v940_v40 = vmul.f32 %v2786_v19, %v914_v48  ;;  %v941_v49 = vmul.f32 %v2786_v19, %v915_v21 }
 0x130   :  { %v948_v32 = vmul.f32 %v2787_v42, %v912_v60  ;;  %v949_v46 = vmul.f32 %v2787_v42, %v913_v61  ;;  %v950_v0 = vmul.f32 %v2787_v42, %v914_v48  ;;  %v951_v51 = vmul.f32 %v2787_v42, %v915_v21 }
 0x131   :  { %v942_v44 = vadd.f32 %v938_v41, %v848_v43  ;;  %v943_v3 = vadd.f32 %v939_v24, %v849_v57  ;;  %v944_v58 = vadd.f32 %v940_v40, %v850_v50  ;;  %v945_v9 = vadd.f32 %v941_v49, %v851_v15 }
 0x132   :  { %v952_v53 = vadd.f32 %v948_v32, %v858_v13  ;;  %v953_v33 = vadd.f32 %v949_v46, %v859_v2  ;;  %v954_v7 = vadd.f32 %v950_v0, %v860_v18  ;;  %v955_v14 = vadd.f32 %v951_v51, %v861_v27 }
 0x133   :  { %v956_v5 = vmax.f32 %v922_v30, 0.0  ;;  %v957_v23 = vmax.f32 %v923_v37, 0.0  ;;  %v958_v16 = vmax.f32 %v924_v12, 0.0  ;;  %v959_v1 = vmax.f32 %v925_v52, 0.0 }
 0x134   :  { %v960_v56 = vmax.f32 %v932_v34, 0.0  ;;  %v961_v59 = vmax.f32 %v933_v4, 0.0  ;;  %v962_v36 = vmax.f32 %v934_v25, 0.0  ;;  %v963_v60 = vmax.f32 %v935_v35, 0.0 }
 0x135   :  { %v964_v61 = vmax.f32 %v942_v44, 0.0  ;;  %v965_v43 = vmax.f32 %v943_v3, 0.0  ;;  %v966_v57 = vmax.f32 %v944_v58, 0.0  ;;  %v967_v50 = vmax.f32 %v945_v9, 0.0 }
 0x136   :  { %v968_v15 = vmax.f32 %v952_v53, 0.0  ;;  %v969_v13 = vmax.f32 %v953_v33, 0.0  ;;  %v970_v2 = vmax.f32 %v954_v7, 0.0  ;;  %v971_v18 = vmax.f32 %v955_v14, 0.0 }
 0x137   :  { %v980_v27 = vmul.f32 %v976_v47, %v956_v5  ;;  %v981_v48 = vmul.f32 %v977_v22, %v957_v23  ;;  %v982_v21 = vmul.f32 %v978_v10, %v958_v16  ;;  %v983_v55 = vmul.f32 %v979_v17, %v959_v1  ;;  %v2788_v16 = vld [vmem:[#allocation31_spill] sm:$0xff] }
 0x138   :  { %v987_v54 = vstv %s2430_s17  ;;  %v1002_v45 = vstv %s2432_s18  ;;  %v1003_v63 = vstv %s2438_s19  ;;  %v1018_v62 = vstv %s2440_s20 }
 0x139   :  { %v988_v8 = vsel %vm1498_vm3, %v2400_v28, %v987_v54  ;;  %v989_v26 = vsel %vm1494_vm2, %v2400_v28, %v987_v54  ;;  %v990_v11 = vsel %vm1502_vm4, %v2400_v28, %v987_v54  ;;  %v991_v47 = vsel %vm1506_vm5, %v2400_v28, %v987_v54 }
 0x13a   :  { %v992_v22 = vmul.f32 %v988_v8, %v960_v56  ;;  %v993_v10 = vmul.f32 %v989_v26, %v961_v59  ;;  %v994_v17 = vmul.f32 %v990_v11, %v962_v36  ;;  %v995_v31 = vmul.f32 %v991_v47, %v963_v60 }
 0x13b   :  { %v1004_v29 = vsel %vm1498_vm3, %v1002_v45, %v1003_v63  ;;  %v1005_v30 = vsel %vm1494_vm2, %v1002_v45, %v1003_v63  ;;  %v1006_v37 = vsel %vm1502_vm4, %v1002_v45, %v1003_v63  ;;  %v1007_v12 = vsel %vm1506_vm5, %v1002_v45, %v1003_v63 }
 0x13c   :  { %v996_v34 = vadd.f32 %v992_v22, %v980_v27  ;;  %v997_v52 = vadd.f32 %v993_v10, %v981_v48  ;;  %v998_v4 = vadd.f32 %v994_v17, %v982_v21  ;;  %v999_v28 = vadd.f32 %v995_v31, %v983_v55 }
 0x13d   :  { %v1008_v25 = vmul.f32 %v1004_v29, %v964_v61  ;;  %v1009_v35 = vmul.f32 %v1005_v30, %v965_v43  ;;  %v1010_v19 = vmul.f32 %v1006_v37, %v966_v57  ;;  %v1011_v41 = vmul.f32 %v1007_v12, %v967_v50 }
 0x13e   :  { %v1019_v24 = vstv %s1156_s21  ;;  %v2789_v56 = vlaneseq }
 0x13f   :  { %v1012_v40 = vadd.f32 %v1008_v25, %v996_v34  ;;  %v1013_v49 = vadd.f32 %v1009_v35, %v997_v52  ;;  %v1014_v42 = vadd.f32 %v1010_v19, %v998_v4  ;;  %v1015_v32 = vadd.f32 %v1011_v41, %v999_v28 }
 0x140   :  { %v1020_v46 = vsel %vm1498_vm3, %v1018_v62, %v1019_v24  ;;  %v1021_v0 = vsel %vm1494_vm2, %v1018_v62, %v1019_v24  ;;  %v1022_v51 = vsel %vm1502_vm4, %v1018_v62, %v1019_v24  ;;  %v1023_v44 = vsel %vm1506_vm5, %v1018_v62, %v1019_v24 }
 0x141   :  { %v1024_v3 = vmul.f32 %v1020_v46, %v968_v15  ;;  %v1025_v58 = vmul.f32 %v1021_v0, %v969_v13  ;;  %v1026_v9 = vmul.f32 %v1022_v51, %v970_v2  ;;  %v1027_v53 = vmul.f32 %v1023_v44, %v971_v18 }
 0x142   :  { %vm1063_vm8 = vcmp.lt.s32.totalorder %v2789_v56, 512 }
 0x143   :  { %v1028_v33 = vadd.f32 %v1024_v3, %v1012_v40  ;;  %v1029_v7 = vadd.f32 %v1025_v58, %v1013_v49  ;;  %v1030_v14 = vadd.f32 %v1026_v9, %v1014_v42  ;;  %v1031_v5 = vadd.f32 %v1027_v53, %v1015_v32 }
 0x145   :  { %v1036_v23 = vcombine.low %v1028_v33, %v1029_v7  ;;  %v1037_v20 = vcombine.low %v1030_v14, %v1031_v5 }
 0x147   :  { %v1044_v1 = vrot.slane %v1036_v23, %v2788_v16  ;;  %v1051_v39 = vrot.slane %v1037_v20, %v2788_v16 }
 0x149   :  { %v1052_v38 = vcombine.low %v1044_v1, %v1051_v39 }
 0x14b   :  { %v1059_v6 = vrot.slane %v1052_v38, %v2788_v16 }
 0x14d   :  { %1065 = vst.msk [vmem:[#allocation7] sm:$0xf] %vm1063_vm8, %v1059_v6 }
 0x14e   :  { %1208 = shalt.err (!%p1205_p1)
}
 0x14f   :  { %s2790_s3 = sld [smem:[#allocation105_spill]] }
 0x155   :  { %s1209_s25 = scalar_lea.hbm %s2790_s3, 64 }
 0x156   :  { %p1210_p2 = scmp.ne.s32.totalorder %s2790_s3, %s1209_s25  ;;  %p1213_p3 = scmp.lt.u32.totalorder %s1209_s25, %s2790_s3 }
 0x158   :  { %p1215_p4 = pnand %p1213_p3, %p1210_p2 }
 0x15a   :  { %1218 = shalt.err (!%p1215_p4)
}
 0x15b   :  { %1075 = dma.vmem_to_hbm [thread:$0]  %s1073_s23, 64, %s2790_s3, [#allocation4]  }
 0x15c   :  { %1223 = dma.done.wait [#allocation4], 64  }
 0x15d   :  { %1224 = vsyncadd [#allocation4], 4294967232 }
 0x15e   :  { %1079 = vsyncpa [#allocation3], 1 }
 0x15f   :  { %1080 = vsyncpa [#allocation4], 1 }
 0x160   :  { %1081 = vsyncpa [#allocation5], 1 }

</bundles_post_ra>
